<compile_context>
chip_gen: v5e
topology: v5e:2x2
jax: 0.10.0
libtpu: 0.0.40
codegen_flags: <defaults>
</compile_context>

<pallas_src>
import jax
import jax.numpy as jnp
from jax.experimental import pallas as pl
from jax.experimental.pallas import tpu as pltpu


# ----------------------------------------------------------------------------- helpers

def _round_up(x, m):
    return (x + m - 1) // m * m


def _estimate_vmem_bytes(tile_h, W, Wp, C, Cout, in_isz, out_isz):
    body = 2 * tile_h * W * C * in_isz            # double-buffered body block
    halo = 2 * 2 * W * C * in_isz                 # double-buffered halo rows (top + bottom)
    outb = 2 * tile_h * W * Cout * out_isz        # double-buffered output block
    slab = (tile_h + 2) * Wp * C * in_isz         # padded slab scratch
    acc = tile_h * Wp * 3 * Cout * 4              # f32 accumulator scratch
    wts = 2 * 3 * C * 3 * Cout * in_isz           # resident packed weights
    return body + halo + outb + slab + acc + wts


def _pick_tile_h(H, W, Wp, C, Cout, in_isz, out_isz, budget_bytes, max_tile_h):
    """Largest divisor of H whose per-step VMEM footprint fits the budget."""
    best = 1
    for t in range(1, H + 1):
        if H % t:
            continue
        if max_tile_h is not None and t > max_tile_h:
            break
        if _estimate_vmem_bytes(t, W, Wp, C, Cout, in_isz, out_isz) <= budget_bytes:
            best = t
    return best


# ----------------------------------------------------------------------------- kernel

def _conv3x3_row_tile_kernel(xb_ref, xtop_ref, xbot_ref, w_ref, o_ref, slab_ref, acc_ref):
    """3x3 / stride-1 / pad-1 / bias-free conv for one (batch, row-tile) grid step.

    xb_ref   : (1, TILE_H, W, C)    body rows of the tile (NHWC, unpadded)
    xtop_ref : (1, 1, W, C)         row above the tile (clamped; zero-masked at top edge)
    xbot_ref : (1, 1, W, C)         row below the tile (clamped; zero-masked at bottom edge)
    w_ref    : (3, C, 3*Cout)       w_ref[dy, ci, dx*Cout + co] = weight[co, ci, dy, dx]
    o_ref    : (1, TILE_H, W, Cout) conv output rows (NHWC)
    slab_ref : (TILE_H+2, Wp, C)    VMEM scratch: zero-padded slab, Wp = round_up(W+2, 8)
    acc_ref  : (TILE_H*Wp, 3*Cout)  VMEM f32 accumulator
    """
    tile_h = xb_ref.shape[1]
    w_cols = xb_ref.shape[2]
    c_in = xb_ref.shape[3]
    wp = slab_ref.shape[1]
    cout = o_ref.shape[3]

    ht = pl.program_id(1)
    n_ht = pl.num_programs(1)

    # ---- assemble the zero-padded slab in VMEM (padding folded into the kernel) --------
    slab_ref[:, 0:1, :] = jnp.zeros((tile_h + 2, 1, c_in), slab_ref.dtype)          # left pad
    slab_ref[:, w_cols + 1:, :] = jnp.zeros(                                         # right pad
        (tile_h + 2, wp - w_cols - 1, c_in), slab_ref.dtype)
    slab_ref[1:tile_h + 1, 1:w_cols + 1, :] = xb_ref[0]                              # body rows

    top_scale = jnp.where(ht > 0, 1.0, 0.0).astype(slab_ref.dtype)                   # image-edge
    bot_scale = jnp.where(ht < n_ht - 1, 1.0, 0.0).astype(slab_ref.dtype)            # zero masks
    slab_ref[0:1, 1:w_cols + 1, :] = xtop_ref[0] * top_scale
    slab_ref[tile_h + 1:tile_h + 2, 1:w_cols + 1, :] = xbot_ref[0] * bot_scale

    # ---- 3 MXU matmuls (one per kernel row dy); dx taps packed along the N dim ---------
    for dy in range(3):
        # Rows [dy, dy + tile_h) of the slab: major-dim slice (free), then a
        # layout-preserving (tile_h, Wp, C) -> (tile_h*Wp, C) collapse (Wp % 8 == 0).
        x2d = slab_ref[dy:dy + tile_h, :, :].reshape(tile_h * wp, c_in)
        contrib = jnp.dot(x2d, w_ref[dy], preferred_element_type=jnp.float32)
        if dy == 0:
            acc_ref[...] = contrib
        else:
            acc_ref[...] += contrib

    # ---- combine the dx shifts on the (narrow) accumulator, cast, store ----------------
    acc3 = acc_ref[...].reshape(tile_h, wp, 3 * cout)
    out = (acc3[:, 0:w_cols, 0:cout]
           + acc3[:, 1:w_cols + 1, cout:2 * cout]
           + acc3[:, 2:w_cols + 2, 2 * cout:3 * cout])
    o_ref[...] = out[None].astype(o_ref.dtype)


# ----------------------------------------------------------------------------- wrapper

def downsample(x_nchw, weight, *, compute_dtype=None, max_tile_h=None,
               vmem_budget_bytes=20 * 1024 * 1024):
    """x_nchw: (B, C, H, W); weight: (C//2, C, 3, 3) torch OIHW.

    Returns (B, 2*C, H//2, W//2) == Conv2d(C, C//2, 3, 1, 1, bias=False) -> PixelUnshuffle(2).
    compute_dtype=jnp.bfloat16 halves HBM traffic for this memory-bound op (f32 accumulate);
    the default (None) keeps the module's f32 semantics exactly.
    """
    B, C, H, W = x_nchw.shape
    Cout = weight.shape[0]
    assert weight.shape == (Cout, C, 3, 3)
    assert H % 2 == 0 and W % 2 == 0, "PixelUnshuffle(2) requires even H and W"

    out_dtype = x_nchw.dtype
    cdt = jnp.dtype(out_dtype if compute_dtype is None else compute_dtype)

    # Channels-last for lane-major matmuls (single layout pass; see TODO above).
    x_nhwc = jnp.transpose(x_nchw, (0, 2, 3, 1)).astype(cdt)

    # OIHW -> (dy, C, 3*Cout): w_packed[dy, ci, dx*Cout + co] = weight[co, ci, dy, dx]
    w_packed = jnp.transpose(weight, (2, 1, 3, 0)).reshape(3, C, 3 * Cout).astype(cdt)

    Wp = _round_up(W + 2, 8)
    in_isz = cdt.itemsize
    out_isz = jnp.dtype(out_dtype).itemsize
    TILE_H = _pick_tile_h(H, W, Wp, C, Cout, in_isz, out_isz, vmem_budget_bytes, max_tile_h)
    n_ht = H // TILE_H

    footprint = _estimate_vmem_bytes(TILE_H, W, Wp, C, Cout, in_isz, out_isz)
    vmem_limit = int(min(56 * 1024 * 1024, max(32 * 1024 * 1024, 2 * footprint)))

    cost = pl.CostEstimate(
        flops=2 * 9 * B * H * W * C * Cout,
        transcendentals=0,
        bytes_accessed=(B * H * W * C * in_isz
                        + B * H * W * Cout * out_isz
                        + 9 * C * Cout * in_isz),
    )

    conv = pl.pallas_call(
        _conv3x3_row_tile_kernel,
        out_shape=jax.ShapeDtypeStruct((B, H, W, Cout), out_dtype),
        grid=(B, n_ht),
        in_specs=[
            # tile body
            pl.BlockSpec((1, TILE_H, W, C), lambda b, h: (b, h, 0, 0)),
            # top halo row (clamped at the image edge; masked to zero in-kernel)
            pl.BlockSpec((1, 1, W, C),
                         lambda b, h: (b, jnp.maximum(h * TILE_H - 1, 0), 0, 0)),
            # bottom halo row (clamped at the image edge; masked to zero in-kernel)
            pl.BlockSpec((1, 1, W, C),
                         lambda b, h: (b, jnp.minimum((h + 1) * TILE_H, H - 1), 0, 0)),
            # packed weights: constant index_map -> resident in VMEM across the grid
            pl.BlockSpec((3, C, 3 * Cout), lambda b, h: (0, 0, 0)),
        ],
        out_specs=pl.BlockSpec((1, TILE_H, W, Cout), lambda b, h: (b, h, 0, 0)),
        scratch_shapes=[
            pltpu.VMEM((TILE_H + 2, Wp, C), cdt),          # padded slab
            pltpu.VMEM((TILE_H * Wp, 3 * Cout), jnp.float32),  # f32 accumulator
        ],
        compiler_params=pltpu.CompilerParams(
            dimension_semantics=("parallel", "parallel"),
            vmem_limit_bytes=vmem_limit,
        ),
        cost_estimate=cost,
    )(x_nhwc, x_nhwc, x_nhwc, w_packed)

    # PixelUnshuffle(2) + NHWC -> NCHW (single fused XLA reshape/transpose; see TODO above):
    #   out[b, c*4 + i*2 + j, h, w] = conv[b, 2h+i, 2w+j, c]
    conv = conv.reshape(B, H // 2, 2, W // 2, 2, Cout)
    return jnp.transpose(conv, (0, 5, 2, 4, 1, 3)).reshape(B, 4 * Cout, H // 2, W // 2)


# ------------------------------------------------------------------------ JAX reference

def reference_downsample(x_nchw, weight):
    B, C, H, W = x_nchw.shape
    Cout = weight.shape[0]
    y = jax.lax.conv_general_dilated(
        x_nchw, weight, window_strides=(1, 1), padding=((1, 1), (1, 1)),
        dimension_numbers=("NCHW", "OIHW", "NCHW"),
        precision=jax.lax.Precision.HIGHEST)
    y = y.reshape(B, Cout, H // 2, 2, W // 2, 2)
    return jnp.transpose(y, (0, 1, 3, 5, 2, 4)).reshape(B, 4 * Cout, H // 2, W // 2)


# ----------------------------------------------------------------------------- main

if __name__ == "__main__":
    key = jax.random.PRNGKey(0)

    def run_case(case_key, B, n_feat, H, W, **kwargs):
        kx, kv = jax.random.split(case_key)
        x = jax.random.normal(kx, (B, n_feat, H, W), dtype=jnp.float32)
        w = 0.1 * jax.random.normal(kv, (n_feat // 2, n_feat, 3, 3), dtype=jnp.float32)
        out = jax.block_until_ready(downsample(x, w, **kwargs))
        assert out.shape == (B, 2 * n_feat, H // 2, W // 2), out.shape
        ref = reference_downsample(x, w)
        if not bool(jnp.allclose(out, ref, atol=1e-2, rtol=1e-2)):
            err = float(jnp.max(jnp.abs(out - ref)))
            raise AssertionError(
                f"mismatch (B={B}, C={n_feat}, H={H}, W={W}, {kwargs}): max abs err {err}")

    k0, k1, k2 = jax.random.split(key, 3)
    # 1) base case: single row-tile per image (halos masked to zero at both edges).
    run_case(k0, B=2, n_feat=4, H=16, W=16)
    # 2) same shapes, forced multi-tile grid -> exercises halo rows / clamped index maps.
    run_case(k1, B=2, n_feat=4, H=16, W=16, max_tile_h=4)
    # 3) width not a multiple of 8 -> exercises the Wp sublane-padding path (no W%8 assert).
    run_case(k2, B=1, n_feat=4, H=12, W=20)

    print("KERNEL_OK")
</pallas_src>

<mosaic_0001>
module attributes {stable_mosaic.version = 11 : i64} {
  func.func @_conv3x3_row_tile_kernel(%arg0: i32, %arg1: i32, %arg2: memref<1x16x16x4xf32, #tpu.memory_space<vmem>>, %arg3: memref<1x1x16x4xf32, #tpu.memory_space<vmem>>, %arg4: memref<1x1x16x4xf32, #tpu.memory_space<vmem>>, %arg5: memref<3x4x6xf32, #tpu.memory_space<vmem>>, %arg6: memref<1x16x16x2xf32, #tpu.memory_space<vmem>>, %arg7: memref<18x24x4xf32, #tpu.memory_space<vmem>>, %arg8: memref<384x6xf32, #tpu.memory_space<vmem>>) attributes {dimension_semantics = [#tpu.dimension_semantics<parallel>, #tpu.dimension_semantics<parallel>], iteration_bounds = array<i64: 2, 1>, scalar_prefetch = 0 : i64, scratch_operands = 2 : i64, tpu.core_type = #tpu.core_type<tc>, window_params = [{transform_indices = @transform_0, window_bounds = array<i64: 1, 16, 16, 4>}, {transform_indices = @transform_1, window_bounds = array<i64: 1, 1, 16, 4>}, {transform_indices = @transform_2, window_bounds = array<i64: 1, 1, 16, 4>}, {pipeline_mode = #tpu.pipeline_mode<synchronous>, transform_indices = @transform_3, window_bounds = array<i64: 3, 4, 6>}, {transform_indices = @transform_4, window_bounds = array<i64: 1, 16, 16, 2>}]} {
    %cst = arith.constant 0.000000e+00 : f32
    %0 = vector.broadcast %cst : f32 to vector<18x1x4xf32>
    %c0 = arith.constant 0 : index
    %c0_0 = arith.constant 0 : index
    %c0_1 = arith.constant 0 : index
    %1 = vector.load %arg7[%c0, %c0_0, %c0_1] : memref<18x24x4xf32, #tpu.memory_space<vmem>>, vector<18x1x4xf32>
    tpu.vector_store %arg7[%c0, %c0_0, %c0_1], %0 {strides = array<i32>} : memref<18x24x4xf32, #tpu.memory_space<vmem>>, vector<18x1x4xf32>,
    %cst_2 = arith.constant 0.000000e+00 : f32
    %2 = vector.broadcast %cst_2 : f32 to vector<18x7x4xf32>
    %c0_3 = arith.constant 0 : index
    %c17 = arith.constant 17 : index
    %c0_4 = arith.constant 0 : index
    %3 = vector.load %arg7[%c0_3, %c17, %c0_4] : memref<18x24x4xf32, #tpu.memory_space<vmem>>, vector<18x7x4xf32>
    tpu.vector_store %arg7[%c0_3, %c17, %c0_4], %2 {strides = array<i32>} : memref<18x24x4xf32, #tpu.memory_space<vmem>>, vector<18x7x4xf32>,
    %c0_5 = arith.constant 0 : index
    %c0_6 = arith.constant 0 : index
    %c0_7 = arith.constant 0 : index
    %c0_8 = arith.constant 0 : index
    %4 = vector.load %arg2[%c0_5, %c0_6, %c0_7, %c0_8] : memref<1x16x16x4xf32, #tpu.memory_space<vmem>>, vector<1x16x16x4xf32>
    %5 = vector.shape_cast %4 : vector<1x16x16x4xf32> to vector<16x16x4xf32>
    %c1 = arith.constant 1 : index
    %c1_9 = arith.constant 1 : index
    %c0_10 = arith.constant 0 : index
    %6 = vector.load %arg7[%c1, %c1_9, %c0_10] : memref<18x24x4xf32, #tpu.memory_space<vmem>>, vector<16x16x4xf32>
    tpu.vector_store %arg7[%c1, %c1_9, %c0_10], %5 {strides = array<i32>} : memref<18x24x4xf32, #tpu.memory_space<vmem>>, vector<16x16x4xf32>,
    %c0_i32 = arith.constant 0 : i32
    %7 = arith.cmpi sgt, %arg1, %c0_i32 : i32
    %cst_11 = arith.constant 1.000000e+00 : f32
    %cst_12 = arith.constant 0.000000e+00 : f32
    %8 = arith.select %7, %cst_11, %cst_12 : f32
    %c0_i32_13 = arith.constant 0 : i32
    %9 = arith.cmpi slt, %arg1, %c0_i32_13 : i32
    %cst_14 = arith.constant 1.000000e+00 : f32
    %cst_15 = arith.constant 0.000000e+00 : f32
    %10 = arith.select %9, %cst_14, %cst_15 : f32
    %c0_16 = arith.constant 0 : index
    %c0_17 = arith.constant 0 : index
    %c0_18 = arith.constant 0 : index
    %c0_19 = arith.constant 0 : index
    %11 = vector.load %arg3[%c0_16, %c0_17, %c0_18, %c0_19] : memref<1x1x16x4xf32, #tpu.memory_space<vmem>>, vector<1x1x16x4xf32>
    %12 = vector.shape_cast %11 : vector<1x1x16x4xf32> to vector<1x16x4xf32>
    %13 = vector.broadcast %8 : f32 to vector<1x16x4xf32>
    %14 = arith.mulf %12, %13 : vector<1x16x4xf32>
    %c0_20 = arith.constant 0 : index
    %c1_21 = arith.constant 1 : index
    %c0_22 = arith.constant 0 : index
    %15 = vector.load %arg7[%c0_20, %c1_21, %c0_22] : memref<18x24x4xf32, #tpu.memory_space<vmem>>, vector<1x16x4xf32>
    tpu.vector_store %arg7[%c0_20, %c1_21, %c0_22], %14 {strides = array<i32>} : memref<18x24x4xf32, #tpu.memory_space<vmem>>, vector<1x16x4xf32>,
    %c0_23 = arith.constant 0 : index
    %c0_24 = arith.constant 0 : index
    %c0_25 = arith.constant 0 : index
    %c0_26 = arith.constant 0 : index
    %16 = vector.load %arg4[%c0_23, %c0_24, %c0_25, %c0_26] : memref<1x1x16x4xf32, #tpu.memory_space<vmem>>, vector<1x1x16x4xf32>
    %17 = vector.shape_cast %16 : vector<1x1x16x4xf32> to vector<1x16x4xf32>
    %18 = vector.broadcast %10 : f32 to vector<1x16x4xf32>
    %19 = arith.mulf %17, %18 : vector<1x16x4xf32>
    %c17_27 = arith.constant 17 : index
    %c1_28 = arith.constant 1 : index
    %c0_29 = arith.constant 0 : index
    %20 = vector.load %arg7[%c17_27, %c1_28, %c0_29] : memref<18x24x4xf32, #tpu.memory_space<vmem>>, vector<1x16x4xf32>
    tpu.vector_store %arg7[%c17_27, %c1_28, %c0_29], %19 {strides = array<i32>} : memref<18x24x4xf32, #tpu.memory_space<vmem>>, vector<1x16x4xf32>,
    %c0_30 = arith.constant 0 : index
    %c0_31 = arith.constant 0 : index
    %c0_32 = arith.constant 0 : index
    %21 = vector.load %arg7[%c0_30, %c0_31, %c0_32] : memref<18x24x4xf32, #tpu.memory_space<vmem>>, vector<16x24x4xf32>
    %22 = vector.shape_cast %21 : vector<16x24x4xf32> to vector<384x4xf32>
    %c0_33 = arith.constant 0 : index
    %c0_34 = arith.constant 0 : index
    %c0_35 = arith.constant 0 : index
    %23 = vector.load %arg5[%c0_33, %c0_34, %c0_35] : memref<3x4x6xf32, #tpu.memory_space<vmem>>, vector<1x4x6xf32>
    %24 = vector.shape_cast %23 : vector<1x4x6xf32> to vector<4x6xf32>
    %cst_36 = arith.constant dense<0.000000e+00> : vector<384x6xf32>
    %25 = tpu.matmul %22, %24, %cst_36 {dimension_numbers = #tpu.dot_dimension_numbers<[1], [0], [0], [1], [0, 0, 1, 1], [], []>} : vector<384x4xf32>, vector<4x6xf32>, vector<384x6xf32> -> vector<384x6xf32>
    %c0_37 = arith.constant 0 : index
    %c0_38 = arith.constant 0 : index
    %26 = vector.load %arg8[%c0_37, %c0_38] : memref<384x6xf32, #tpu.memory_space<vmem>>, vector<384x6xf32>
    tpu.vector_store %arg8[%c0_37, %c0_38], %25 {strides = array<i32>} : memref<384x6xf32, #tpu.memory_space<vmem>>, vector<384x6xf32>,
    %c1_39 = arith.constant 1 : index
    %c0_40 = arith.constant 0 : index
    %c0_41 = arith.constant 0 : index
    %27 = vector.load %arg7[%c1_39, %c0_40, %c0_41] : memref<18x24x4xf32, #tpu.memory_space<vmem>>, vector<16x24x4xf32>
    %28 = vector.shape_cast %27 : vector<16x24x4xf32> to vector<384x4xf32>
    %c1_42 = arith.constant 1 : index
    %c0_43 = arith.constant 0 : index
    %c0_44 = arith.constant 0 : index
    %29 = vector.load %arg5[%c1_42, %c0_43, %c0_44] : memref<3x4x6xf32, #tpu.memory_space<vmem>>, vector<1x4x6xf32>
    %30 = vector.shape_cast %29 : vector<1x4x6xf32> to vector<4x6xf32>
    %cst_45 = arith.constant dense<0.000000e+00> : vector<384x6xf32>
    %31 = tpu.matmul %28, %30, %cst_45 {dimension_numbers = #tpu.dot_dimension_numbers<[1], [0], [0], [1], [0, 0, 1, 1], [], []>} : vector<384x4xf32>, vector<4x6xf32>, vector<384x6xf32> -> vector<384x6xf32>
    %c0_46 = arith.constant 0 : index
    %c0_47 = arith.constant 0 : index
    %32 = vector.load %arg8[%c0_46, %c0_47] : memref<384x6xf32, #tpu.memory_space<vmem>>, vector<384x6xf32>
    %33 = arith.addf %32, %31 : vector<384x6xf32>
    %c0_48 = arith.constant 0 : index
    %c0_49 = arith.constant 0 : index
    %34 = vector.load %arg8[%c0_48, %c0_49] : memref<384x6xf32, #tpu.memory_space<vmem>>, vector<384x6xf32>
    tpu.vector_store %arg8[%c0_48, %c0_49], %33 {strides = array<i32>} : memref<384x6xf32, #tpu.memory_space<vmem>>, vector<384x6xf32>,
    %c2 = arith.constant 2 : index
    %c0_50 = arith.constant 0 : index
    %c0_51 = arith.constant 0 : index
    %35 = vector.load %arg7[%c2, %c0_50, %c0_51] : memref<18x24x4xf32, #tpu.memory_space<vmem>>, vector<16x24x4xf32>
    %36 = vector.shape_cast %35 : vector<16x24x4xf32> to vector<384x4xf32>
    %c2_52 = arith.constant 2 : index
    %c0_53 = arith.constant 0 : index
    %c0_54 = arith.constant 0 : index
    %37 = vector.load %arg5[%c2_52, %c0_53, %c0_54] : memref<3x4x6xf32, #tpu.memory_space<vmem>>, vector<1x4x6xf32>
    %38 = vector.shape_cast %37 : vector<1x4x6xf32> to vector<4x6xf32>
    %cst_55 = arith.constant dense<0.000000e+00> : vector<384x6xf32>
    %39 = tpu.matmul %36, %38, %cst_55 {dimension_numbers = #tpu.dot_dimension_numbers<[1], [0], [0], [1], [0, 0, 1, 1], [], []>} : vector<384x4xf32>, vector<4x6xf32>, vector<384x6xf32> -> vector<384x6xf32>
    %c0_56 = arith.constant 0 : index
    %c0_57 = arith.constant 0 : index
    %40 = vector.load %arg8[%c0_56, %c0_57] : memref<384x6xf32, #tpu.memory_space<vmem>>, vector<384x6xf32>
    %41 = arith.addf %40, %39 : vector<384x6xf32>
    %c0_58 = arith.constant 0 : index
    %c0_59 = arith.constant 0 : index
    %42 = vector.load %arg8[%c0_58, %c0_59] : memref<384x6xf32, #tpu.memory_space<vmem>>, vector<384x6xf32>
    tpu.vector_store %arg8[%c0_58, %c0_59], %41 {strides = array<i32>} : memref<384x6xf32, #tpu.memory_space<vmem>>, vector<384x6xf32>,
    %c0_60 = arith.constant 0 : index
    %c0_61 = arith.constant 0 : index
    %43 = vector.load %arg8[%c0_60, %c0_61] : memref<384x6xf32, #tpu.memory_space<vmem>>, vector<384x6xf32>
    %44 = vector.shape_cast %43 : vector<384x6xf32> to vector<16x24x6xf32>
    %45 = vector.extract_strided_slice %44 {offsets = [0, 0, 0], sizes = [16, 16, 2], strides = [1, 1, 1]} : vector<16x24x6xf32> to vector<16x16x2xf32>
    %46 = vector.extract_strided_slice %44 {offsets = [0, 1, 2], sizes = [16, 16, 2], strides = [1, 1, 1]} : vector<16x24x6xf32> to vector<16x16x2xf32>
    %47 = arith.addf %45, %46 : vector<16x16x2xf32>
    %48 = vector.extract_strided_slice %44 {offsets = [0, 2, 4], sizes = [16, 16, 2], strides = [1, 1, 1]} : vector<16x24x6xf32> to vector<16x16x2xf32>
    %49 = arith.addf %47, %48 : vector<16x16x2xf32>
    %50 = vector.shape_cast %49 : vector<16x16x2xf32> to vector<1x16x16x2xf32>
    %c0_62 = arith.constant 0 : index
    %c0_63 = arith.constant 0 : index
    %c0_64 = arith.constant 0 : index
    %c0_65 = arith.constant 0 : index
    %51 = vector.load %arg6[%c0_62, %c0_63, %c0_64, %c0_65] : memref<1x16x16x2xf32, #tpu.memory_space<vmem>>, vector<1x16x16x2xf32>
    tpu.vector_store %arg6[%c0_62, %c0_63, %c0_64, %c0_65], %50 {strides = array<i32>} : memref<1x16x16x2xf32, #tpu.memory_space<vmem>>, vector<1x16x16x2xf32>,
    return
  }
  func.func @transform_0(%arg0: i32, %arg1: i32) -> (i32, i32, i32, i32) {
    %c0_i32 = arith.constant 0 : i32
    %c0_i32_0 = arith.constant 0 : i32
    %c0_i32_1 = arith.constant 0 : i32
    return %arg0, %arg1, %c0_i32, %c0_i32_0 : i32, i32, i32, i32
  }
  func.func @transform_1(%arg0: i32, %arg1: i32) -> (i32, i32, i32, i32) {
    %c16_i32 = arith.constant 16 : i32
    %0 = arith.muli %arg1, %c16_i32 : i32
    %c1_i32 = arith.constant 1 : i32
    %1 = arith.subi %0, %c1_i32 : i32
    %c0_i32 = arith.constant 0 : i32
    %2 = arith.maxsi %1, %c0_i32 : i32
    %c0_i32_0 = arith.constant 0 : i32
    %c0_i32_1 = arith.constant 0 : i32
    %c0_i32_2 = arith.constant 0 : i32
    return %arg0, %2, %c0_i32_0, %c0_i32_1 : i32, i32, i32, i32
  }
  func.func @transform_2(%arg0: i32, %arg1: i32) -> (i32, i32, i32, i32) {
    %c1_i32 = arith.constant 1 : i32
    %0 = arith.addi %arg1, %c1_i32 : i32
    %c16_i32 = arith.constant 16 : i32
    %1 = arith.muli %0, %c16_i32 : i32
    %c15_i32 = arith.constant 15 : i32
    %2 = arith.minsi %1, %c15_i32 : i32
    %c0_i32 = arith.constant 0 : i32
    %c0_i32_0 = arith.constant 0 : i32
    %c0_i32_1 = arith.constant 0 : i32
    return %arg0, %2, %c0_i32, %c0_i32_0 : i32, i32, i32, i32
  }
  func.func @transform_3(%arg0: i32, %arg1: i32) -> (i32, i32, i32) {
    %c0_i32 = arith.constant 0 : i32
    %c0_i32_0 = arith.constant 0 : i32
    %c0_i32_1 = arith.constant 0 : i32
    %c0_i32_2 = arith.constant 0 : i32
    return %c0_i32, %c0_i32_0, %c0_i32_1 : i32, i32, i32
  }
  func.func @transform_4(%arg0: i32, %arg1: i32) -> (i32, i32, i32, i32) {
    %c0_i32 = arith.constant 0 : i32
    %c0_i32_0 = arith.constant 0 : i32
    %c0_i32_1 = arith.constant 0 : i32
    return %arg0, %arg1, %c0_i32, %c0_i32_0 : i32, i32, i32, i32
  }
}

</mosaic_0001>

<bundles_post_ra>
// kernel: tpu_custom_call.1
= control target key start
LH: loop header
LB: loop body
LE: loop exit
PB: predicated region body
PF: predicated region fallthrough
CT: control target
= control target key end

     0   :  { %s2838_s15 = smov 0   ;;  %s2840_s16 = smov 0   ;;  %s3845_s0 = inlined_call_operand.vmem [shape: f32[2,16,16,4], index: 0, kind: input, shape index: {}]   ;;  %s3846_s1 = inlined_call_operand.vmem [shape: f32[2,16,16,4], index: 1, kind: input, shape index: {}]   ;;  %s3847_s2 = inlined_call_operand.vmem [shape: f32[2,16,16,4], index: 2, kind: input, shape index: {}]   ;;  %s3848_s3 = inlined_call_operand.vmem [shape: f32[3,4,6], index: 3, kind: input, shape index: {}]   ;;  %s3849_s4 = inlined_call_operand.vmem [shape: f32[2,16,16,2], index: 4, kind: output, shape index: {}]  }
   0x1   :  { %s2842_s17 = smov 0  }
   0x2 LB: > { %s26_s18 = sadd.s32 1, %s2804_s16  ;;  %p2590_p0 = scmp.ge.s32.totalorder %s2808_s17, 1  ;;  %s2808_s17 = sphi %s2842_s17, %s14_s17   ;;  %s2804_s16 = sphi %s2840_s16, %s3851_s16   ;;  %s2800_s15 = sphi %s2838_s15, %s3850_s15  }
   0x3   : > { %p28_p1 = scmp.ge.s32.totalorder %s26_s18, 2  ;;  %p248_p2 = scmp.lt.s32.totalorder %s2808_s17, 3 }
   0x5   : > { %s3853_s18 = smov (%p28_p1, %s26_s18), 0  ;;  %p249_p3 = pnand %p2590_p0, %p248_p2 }
   0x6   : > { %p311_p4 = scmp.lt.s32.totalorder (!%p249_p3), %s2800_s15, 1  ;;  %s2811_s6 = smov (!%p249_p3), 124  }
   0x7   : > { %252 = sbr.rel (%p249_p3) target bundleno = 611 (0x263), region = 36  ;;  %s2812_s7 = smov (!%p249_p3), 126  }
   0xc   : > { %v537_v0 = vld [vmem:[%s3848_s3] sm:$0xf]  ;;  %vm682_vm0 = vcmask 1043456   ;;  %vm366_vm1 = vcmask 24576   ;;  %v2810_v1 = vmov 0.0   ;;  %s3855_s15 = smov (!%p311_p4, %s2800_s15), 1 }
   0xd   : > { %2756 = vmatpush.msk.msra.mxu3 %vm682_vm0, %v537_v0  ;;  %379 = vst.msk [vmem:[#allocation2 + $0x120] sm:$0x1] %vm366_vm1, %v2810_v1  ;;  %v2648_v2 = vld [vmem:[%s3848_s3 + $0x4] sm:$0xf]  ;;  %2599 = vmatpush.msk.msra.mxu0 %vm682_vm0, %v537_v0  ;;  %s2872_s23 = sshll.u32 %s3855_s15, 8  ;;  %vm437_vm2 = vcmask 31744  }
   0xe   : > { %367 = vst.msk [vmem:[#allocation2] sm:$0x1] %vm366_vm1, %v2810_v1  ;;  %2649 = vmatpush.msk.msra.mxu1 %vm682_vm0, %v2648_v2  ;;  %v2698_v3 = vld [vmem:[%s3848_s3 + $0x8] sm:$0xf]  ;;  %s2883_s28 = scalar_lea.vmem %s3845_s0, %s2872_s23  ;;  %s333_s5 = scalar_lea.vmem %s3846_s1, %s2872_s23  ;;  %vm385_vm3 = vcmask 30720   ;;  %vm847_vm4 = vcmask 48128  }
   0xf   : > { %2757 = vmatpush.msk.msrb.mxu3 %vm682_vm0, %v2648_v2  ;;  %368 = vst.msk [vmem:[#allocation2 + $0x18] sm:$0x1] %vm366_vm1, %v2810_v1  ;;  %2699 = vmatpush.msk.msra.mxu2 %vm682_vm0, %v2698_v3  ;;  %v426_v4 = vld [vmem:[%s2883_s28 + $0xb0] sm:$0xff]  ;;  %v474_v5 = vld [vmem:[%s333_s5] sm:$0xff]  ;;  %v475_v7 = vld [vmem:[%s333_s5 + $0x8] sm:$0xff]  ;;  %vm2206_vm5 = vcmask 1045504   ;;  %s3485_s14 = scalar_lea.vmem %s3849_s4, %s2872_s23 }
  0x10   : > { %369 = vst.msk [vmem:[#allocation2 + $0x30] sm:$0x1] %vm366_vm1, %v2810_v1  ;;  %v477_v8 = vmul.f32 0.0, %v474_v5  ;;  %v427_v9 = vld [vmem:[%s2883_s28 + $0xb8] sm:$0xff]  ;;  %v478_v10 = vmul.f32 0.0, %v475_v7  ;;  %v404_v11 = vld [vmem:[%s2883_s28] sm:$0xff] }
  0x11   : > { %370 = vst.msk [vmem:[#allocation2 + $0x48] sm:$0x1] %vm366_vm1, %v2810_v1  ;;  %v406_v12 = vld [vmem:[%s2883_s28 + $0x10] sm:$0xff]  ;;  %v405_v19 = vld [vmem:[%s2883_s28 + $0x8] sm:$0xff]  ;;  %v407_v21 = vld [vmem:[%s2883_s28 + $0x18] sm:$0xff]  ;;  %vm1997_vm6 = vcmask 1046528  }
  0x12   : > { %371 = vst.msk [vmem:[#allocation2 + $0x60] sm:$0x1] %vm366_vm1, %v2810_v1  ;;  %v428_v22 = vld [vmem:[%s2883_s28 + $0xc0] sm:$0xff]  ;;  %v429_v23 = vld [vmem:[%s2883_s28 + $0xc8] sm:$0xff]  ;;  %v430_v26 = vld [vmem:[%s2883_s28 + $0xd0] sm:$0xff]  ;;  %s2753_s8 = sadd.s32 240, %s2872_s23 }
  0x13   : > { %460 = vst.msk [vmem:[#allocation2 + $0x121] sm:$0xff] %vm437_vm2, %v426_v4  ;;  %v408_v24 = vld [vmem:[%s2883_s28 + $0x20] sm:$0xff]  ;;  %v409_v25 = vld [vmem:[%s2883_s28 + $0x28] sm:$0xff]  ;;  %v431_v27 = vld [vmem:[%s2883_s28 + $0xd8] sm:$0xff]  ;;  %s3333_s11 = scalar_lea.vmem %s3847_s2, %s2753_s8  ;;  %vm2415_vm7 = vcmask 15360  }
  0x14   : > { %372 = vst.msk [vmem:[#allocation2 + $0x78] sm:$0x1] %vm366_vm1, %v2810_v1  ;;  %v410_v31 = vld [vmem:[%s2883_s28 + $0x30] sm:$0xff]  ;;  %v411_v35 = vld [vmem:[%s2883_s28 + $0x38] sm:$0xff]  ;;  %v432_v36 = vld [vmem:[%s2883_s28 + $0xe0] sm:$0xff] }
  0x15   : > { %373 = vst.msk [vmem:[#allocation2 + $0x90] sm:$0x1] %vm366_vm1, %v2810_v1  ;;  %v433_v39 = vld [vmem:[%s2883_s28 + $0xe8] sm:$0xff]  ;;  %v412_v42 = vld [vmem:[%s2883_s28 + $0x40] sm:$0xff]  ;;  %v414_v50 = vld [vmem:[%s2883_s28 + $0x50] sm:$0xff] }
  0x16   : > { %374 = vst.msk [vmem:[#allocation2 + $0xa8] sm:$0x1] %vm366_vm1, %v2810_v1  ;;  %v413_v45 = vld [vmem:[%s2883_s28 + $0x48] sm:$0xff]  ;;  %v415_v53 = vld [vmem:[%s2883_s28 + $0x58] sm:$0xff]  ;;  %v416_v57 = vld [vmem:[%s2883_s28 + $0x60] sm:$0xff] }
  0x17   : > { %375 = vst.msk [vmem:[#allocation2 + $0xc0] sm:$0x1] %vm366_vm1, %v2810_v1  ;;  %v417_v59 = vld [vmem:[%s2883_s28 + $0x68] sm:$0xff]  ;;  %v418_v63 = vld [vmem:[%s2883_s28 + $0x70] sm:$0xff]  ;;  %v419_v2 = vld [vmem:[%s2883_s28 + $0x78] sm:$0xff] }
  0x18   : > { %376 = vst.msk [vmem:[#allocation2 + $0xd8] sm:$0x1] %vm366_vm1, %v2810_v1  ;;  %v434_v4 = vld [vmem:[%s2883_s28 + $0xf0] sm:$0xff] }
  0x19   : > { %377 = vst.msk [vmem:[#allocation2 + $0xf0] sm:$0x1] %vm366_vm1, %v2810_v1 }
  0x1a   : > { %v525_v6 = vld [vmem:[#allocation2 + $0x120] sm:$0xff]  ;;  %378 = vst.msk [vmem:[#allocation2 + $0x108] sm:$0x1] %vm366_vm1, %v2810_v1 }
  0x1b   : > { %2636 = vmatmul.msk.f32.vlgmr.msra.gmra.mxu3 %vm437_vm2, %v525_v6  ;;  %380 = vst.msk [vmem:[#allocation2 + $0x138] sm:$0x1] %vm366_vm1, %v2810_v1 }
  0x1c   : > { %381 = vst.msk [vmem:[#allocation2 + $0x150] sm:$0x1] %vm366_vm1, %v2810_v1  ;;  %2758 = vmatpush.msk.msra.mxu3 %vm682_vm0, %v2698_v3 }
  0x1d   : > { %382 = vst.msk [vmem:[#allocation2 + $0x168] sm:$0x1] %vm366_vm1, %v2810_v1 }
  0x1e   : > { %383 = vst.msk [vmem:[#allocation2 + $0x180] sm:$0x1] %vm366_vm1, %v2810_v1 }
  0x1f   : > { %384 = vst.msk [vmem:[#allocation2 + $0x198] sm:$0x1] %vm366_vm1, %v2810_v1 }
  0x20   : > { %479 = vst.msk [vmem:[#allocation2 + $0x1] sm:$0xff] %vm437_vm2, %v477_v8 }
  0x21   : > { %461 = vst.msk [vmem:[#allocation2 + $0x129] sm:$0xff] %vm437_vm2, %v427_v9 }
  0x22   : > { %480 = vst.msk [vmem:[#allocation2 + $0x9] sm:$0xff] %vm437_vm2, %v478_v10 }
  0x23   : > { %438 = vst.msk [vmem:[#allocation2 + $0x19] sm:$0xff] %vm437_vm2, %v404_v11  ;;  %v435_v11 = vld [vmem:[%s2883_s28 + $0xf8] sm:$0xff] }
  0x24   : > { %440 = vst.msk [vmem:[#allocation2 + $0x31] sm:$0xff] %vm437_vm2, %v406_v12 }
  0x25   : > { %398 = vst.msk [vmem:[#allocation2 + $0x131] sm:$0x7f] %vm385_vm3, %v2810_v1 }
  0x26   : > { %386 = vst.msk [vmem:[#allocation2 + $0x11] sm:$0x7f] %vm385_vm3, %v2810_v1 }
  0x27   : > { %v489_v13 = vld [vmem:[#allocation2] sm:$0xff]  ;;  %387 = vst.msk [vmem:[#allocation2 + $0x29] sm:$0x7f] %vm385_vm3, %v2810_v1 }
  0x28   : > { %2600 = vmatmul.msk.f32.vlgmr.msra.gmra.mxu0 %vm437_vm2, %v489_v13  ;;  %v526_v14 = vld [vmem:[#allocation2 + $0x128] sm:$0xff]  ;;  %388 = vst.msk [vmem:[#allocation2 + $0x41] sm:$0x7f] %vm385_vm3, %v2810_v1 }
  0x29   : > { %2637 = vmatmul.msk.f32.gmra.mxu3 %vm437_vm2, %v526_v14  ;;  %389 = vst.msk [vmem:[#allocation2 + $0x59] sm:$0x7f] %vm385_vm3, %v2810_v1  ;;  %v490_v17 = vld [vmem:[#allocation2 + $0x8] sm:$0xff] }
  0x2a   : > { %v896_v15 = vld [vmem:[#allocation2 + $0x18] sm:$0xff]  ;;  %390 = vst.msk [vmem:[#allocation2 + $0x71] sm:$0x7f] %vm385_vm3, %v2810_v1 }
  0x2b   : > { %2650 = vmatmul.msk.f32.vlgmr.msra.gmra.mxu1 %vm437_vm2, %v896_v15  ;;  %v2945_v16 = vld [vmem:[#allocation2 + $0x30] sm:$0xff]  ;;  %391 = vst.msk [vmem:[#allocation2 + $0x89] sm:$0x7f] %vm385_vm3, %v2810_v1 }
  0x2c   : > { %2700 = vmatmul.msk.f32.vlgmr.msra.gmra.mxu2 %vm437_vm2, %v2945_v16  ;;  %392 = vst.msk [vmem:[#allocation2 + $0xa1] sm:$0x7f] %vm385_vm3, %v2810_v1  ;;  %v527_v18 = vld [vmem:[#allocation2 + $0x130] sm:$0xff] }
  0x2d   : > { %393 = vst.msk [vmem:[#allocation2 + $0xb9] sm:$0x7f] %vm385_vm3, %v2810_v1  ;;  %v491_v20 = vld [vmem:[#allocation2 + $0x10] sm:$0xff] }
  0x2e   : > { %394 = vst.msk [vmem:[#allocation2 + $0xd1] sm:$0x7f] %vm385_vm3, %v2810_v1 }
  0x2f   : > { %395 = vst.msk [vmem:[#allocation2 + $0xe9] sm:$0x7f] %vm385_vm3, %v2810_v1 }
  0x30   : > { %2601 = vmatmul.msk.f32.gmra.mxu0 %vm437_vm2, %v490_v17  ;;  %396 = vst.msk [vmem:[#allocation2 + $0x101] sm:$0x7f] %vm385_vm3, %v2810_v1 }
  0x31   : > { %2638 = vmatmul.msk.f32.gmra.mxu3 %vm437_vm2, %v527_v18  ;;  %397 = vst.msk [vmem:[#allocation2 + $0x119] sm:$0x7f] %vm385_vm3, %v2810_v1  ;;  %v420_v18 = vld [vmem:[%s2883_s28 + $0x80] sm:$0xff] }
  0x32   : > { %399 = vst.msk [vmem:[#allocation2 + $0x149] sm:$0x7f] %vm385_vm3, %v2810_v1 }
  0x33   : > { %400 = vst.msk [vmem:[#allocation2 + $0x161] sm:$0x7f] %vm385_vm3, %v2810_v1 }
  0x34   : > { %401 = vst.msk [vmem:[#allocation2 + $0x179] sm:$0x7f] %vm385_vm3, %v2810_v1 }
  0x35   : > { %402 = vst.msk [vmem:[#allocation2 + $0x191] sm:$0x7f] %vm385_vm3, %v2810_v1 }
  0x36   : > { %403 = vst.msk [vmem:[#allocation2 + $0x1a9] sm:$0x7f] %vm385_vm3, %v2810_v1 }
  0x37   : > { %439 = vst.msk [vmem:[#allocation2 + $0x21] sm:$0xff] %vm437_vm2, %v405_v19 }
  0x38   : > { %2602 = vmatmul.msk.f32.gmra.mxu0 %vm437_vm2, %v491_v20  ;;  %441 = vst.msk [vmem:[#allocation2 + $0x39] sm:$0xff] %vm437_vm2, %v407_v21 }
  0x39   : > { %462 = vst.msk [vmem:[#allocation2 + $0x139] sm:$0xff] %vm437_vm2, %v428_v22 }
  0x3a   : > { %463 = vst.msk [vmem:[#allocation2 + $0x141] sm:$0xff] %vm437_vm2, %v429_v23 }
  0x3b   : > { %442 = vst.msk [vmem:[#allocation2 + $0x49] sm:$0xff] %vm437_vm2, %v408_v24  ;;  %v421_v24 = vld [vmem:[%s2883_s28 + $0x88] sm:$0xff] }
  0x3c   : > { %443 = vst.msk [vmem:[#allocation2 + $0x51] sm:$0xff] %vm437_vm2, %v409_v25 }
  0x3d   : > { %464 = vst.msk [vmem:[#allocation2 + $0x151] sm:$0xff] %vm437_vm2, %v430_v26 }
  0x3e   : > { %v897_v28 = vld [vmem:[#allocation2 + $0x20] sm:$0xff]  ;;  %465 = vst.msk [vmem:[#allocation2 + $0x159] sm:$0xff] %vm437_vm2, %v431_v27  ;;  %v898_v32 = vld [vmem:[#allocation2 + $0x28] sm:$0xff] }
  0x3f   : > { %2651 = vmatmul.msk.f32.gmra.mxu1 %vm437_vm2, %v897_v28  ;;  %v1400_v29 = vld [vmem:[#allocation2 + $0x38] sm:$0xff]  ;;  %444 = vst.msk [vmem:[#allocation2 + $0x61] sm:$0xff] %vm437_vm2, %v410_v31  ;;  %v1401_v33 = vld [vmem:[#allocation2 + $0x40] sm:$0xff] }
  0x40   : > { %2701 = vmatmul.msk.f32.gmra.mxu2 %vm437_vm2, %v1400_v29  ;;  %v2994_v30 = vld [vmem:[#allocation2 + $0x138] sm:$0xff]  ;;  %2603 = vmatmul.msk.f32.gmra.mxu0 %vm437_vm2, %v896_v15  ;;  %445 = vst.msk [vmem:[#allocation2 + $0x69] sm:$0xff] %vm437_vm2, %v411_v35 }
  0x41   : > { %2639 = vmatmul.msk.f32.gmra.mxu3 %vm437_vm2, %v2994_v30  ;;  %v3001_v34 = vld [vmem:[#allocation2 + $0x140] sm:$0xff]  ;;  %466 = vst.msk [vmem:[#allocation2 + $0x169] sm:$0xff] %vm437_vm2, %v432_v36  ;;  %v3012_v38 = vld [vmem:[#allocation2 + $0x148] sm:$0xff] }
  0x42   : > { %v1402_v37 = vld [vmem:[#allocation2 + $0x48] sm:$0xff]  ;;  %467 = vst.msk [vmem:[#allocation2 + $0x171] sm:$0xff] %vm437_vm2, %v433_v39 }
  0x43   : > { %v1403_v40 = vld [vmem:[#allocation2 + $0x50] sm:$0xff]  ;;  %446 = vst.msk [vmem:[#allocation2 + $0x79] sm:$0xff] %vm437_vm2, %v412_v42  ;;  %v1404_v43 = vld [vmem:[#allocation2 + $0x58] sm:$0xff] }
  0x44   : > { %v3022_v41 = vld [vmem:[#allocation2 + $0x150] sm:$0xff]  ;;  %447 = vst.msk [vmem:[#allocation2 + $0x81] sm:$0xff] %vm437_vm2, %v413_v45 }
  0x45   : > { %v3032_v44 = vld [vmem:[#allocation2 + $0x158] sm:$0xff]  ;;  %v3041_v47 = vld [vmem:[#allocation2 + $0x160] sm:$0xff]  ;;  %448 = vst.msk [vmem:[#allocation2 + $0x91] sm:$0xff] %vm437_vm2, %v414_v50 }
  0x46   : > { %v1405_v46 = vld [vmem:[#allocation2 + $0x60] sm:$0xff]  ;;  %449 = vst.msk [vmem:[#allocation2 + $0x99] sm:$0xff] %vm437_vm2, %v415_v53 }
  0x47   : > { %2652 = vmatmul.msk.f32.gmra.mxu1 %vm437_vm2, %v898_v32  ;;  %v1406_v48 = vld [vmem:[#allocation2 + $0x68] sm:$0xff]  ;;  %v1407_v51 = vld [vmem:[#allocation2 + $0x70] sm:$0xff]  ;;  %450 = vst.msk [vmem:[#allocation2 + $0xa9] sm:$0xff] %vm437_vm2, %v416_v57 }
  0x48   : > { %2702 = vmatmul.msk.f32.gmra.mxu2 %vm437_vm2, %v1401_v33  ;;  %2604 = vmatmul.msk.f32.gmra.mxu0 %vm437_vm2, %v897_v28  ;;  %v3048_v49 = vld [vmem:[#allocation2 + $0x168] sm:$0xff]  ;;  %451 = vst.msk [vmem:[#allocation2 + $0xb1] sm:$0xff] %vm437_vm2, %v417_v59 }
  0x49   : > { %2640 = vmatmul.msk.f32.gmra.mxu3 %vm437_vm2, %v3001_v34  ;;  %v3057_v52 = vld [vmem:[#allocation2 + $0x170] sm:$0xff]  ;;  %v3066_v55 = vld [vmem:[#allocation2 + $0x178] sm:$0xff]  ;;  %452 = vst.msk [vmem:[#allocation2 + $0xc1] sm:$0xff] %vm437_vm2, %v418_v63 }
  0x4a   : > { %v1408_v54 = vld [vmem:[#allocation2 + $0x78] sm:$0xff]  ;;  %453 = vst.msk [vmem:[#allocation2 + $0xc9] sm:$0xff] %vm437_vm2, %v419_v2 }
  0x4b   : > { %v1409_v56 = vld [vmem:[#allocation2 + $0x80] sm:$0xff]  ;;  %v1410_v58 = vld [vmem:[#allocation2 + $0x88] sm:$0xff]  ;;  %468 = vst.msk [vmem:[#allocation2 + $0x181] sm:$0xff] %vm437_vm2, %v434_v4 }
  0x4c   : > { %v1411_v60 = vld [vmem:[#allocation2 + $0x90] sm:$0xff]  ;;  %469 = vst.msk [vmem:[#allocation2 + $0x189] sm:$0xff] %vm437_vm2, %v435_v11 }
  0x4d   : > { %v1412_v61 = vld [vmem:[#allocation2 + $0x98] sm:$0xff]  ;;  %v3100_v0 = vld [vmem:[#allocation2 + $0xa0] sm:$0xff]  ;;  %454 = vst.msk [vmem:[#allocation2 + $0xd9] sm:$0xff] %vm437_vm2, %v420_v18 }
  0x4e   : > { %v3112_v5 = vld [vmem:[#allocation2 + $0xa8] sm:$0xff]  ;;  %455 = vst.msk [vmem:[#allocation2 + $0xe1] sm:$0xff] %vm437_vm2, %v421_v24 }
  0x4f   : > { %2653 = vmatmul.msk.f32.gmra.mxu1 %vm437_vm2, %v2945_v16  ;;  %v3125_v12 = vld [vmem:[#allocation2 + $0xb0] sm:$0xff]  ;;  %v3139_v21 = vld [vmem:[#allocation2 + $0xb8] sm:$0xff] }
  0x50   : > { %2703 = vmatmul.msk.f32.gmra.mxu2 %vm437_vm2, %v1402_v37  ;;  %2605 = vmatmul.msk.f32.gmra.mxu0 %vm437_vm2, %v898_v32 }
  0x51   : > { %2641 = vmatmul.msk.f32.gmra.mxu3 %vm437_vm2, %v3012_v38  ;;  %v3197_v63 = vld [vmem:[#allocation2 + $0xd0] sm:$0xff] }
  0x53   : > { %v3200_v2 = vld [vmem:[#allocation2 + $0x188] sm:$0xff] }
  0x57   : > { %2654 = vmatmul.msk.f32.gmra.mxu1 %vm437_vm2, %v1400_v29 }
  0x58   : > { %2704 = vmatmul.msk.f32.gmra.mxu2 %vm437_vm2, %v1403_v40  ;;  %2606 = vmatmul.msk.f32.gmra.mxu0 %vm437_vm2, %v2945_v16 }
  0x59   : > { %2642 = vmatmul.msk.f32.gmra.mxu3 %vm437_vm2, %v3022_v41 }
  0x5f   : > { %2655 = vmatmul.msk.f32.gmra.mxu1 %vm437_vm2, %v1401_v33 }
  0x60   : > { %2705 = vmatmul.msk.f32.gmra.mxu2 %vm437_vm2, %v1404_v43  ;;  %2607 = vmatmul.msk.f32.gmra.mxu0 %vm437_vm2, %v1400_v29  ;;  %v3153_v29 = vld [vmem:[#allocation2 + $0xc0] sm:$0xff] }
  0x61   : > { %2643 = vmatmul.msk.f32.gmra.mxu3 %vm437_vm2, %v3032_v44 }
  0x67   : > { %2656 = vmatmul.msk.f32.gmra.mxu1 %vm437_vm2, %v1402_v37 }
  0x68   : > { %2706 = vmatmul.msk.f32.gmra.mxu2 %vm437_vm2, %v1405_v46  ;;  %2608 = vmatmul.msk.f32.gmra.mxu0 %vm437_vm2, %v1401_v33 }
  0x69   : > { %2644 = vmatmul.msk.f32.gmra.mxu3 %vm437_vm2, %v3041_v47 }
  0x6f   : > { %2657 = vmatmul.msk.f32.gmra.mxu1 %vm437_vm2, %v1403_v40 }
  0x70   : > { %2707 = vmatmul.msk.f32.gmra.mxu2 %vm437_vm2, %v1406_v48  ;;  %2609 = vmatmul.msk.f32.gmra.mxu0 %vm437_vm2, %v1402_v37 }
  0x71   : > { %2645 = vmatmul.msk.f32.gmra.mxu3 %vm437_vm2, %v3048_v49 }
  0x77   : > { %2658 = vmatmul.msk.f32.gmra.mxu1 %vm437_vm2, %v1404_v43 }
  0x78   : > { %2708 = vmatmul.msk.f32.gmra.mxu2 %vm437_vm2, %v1407_v51  ;;  %2610 = vmatmul.msk.f32.gmra.mxu0 %vm437_vm2, %v1403_v40 }
  0x79   : > { %2646 = vmatmul.msk.f32.gmra.mxu3 %vm437_vm2, %v3057_v52 }
  0x7f   : > { %2659 = vmatmul.msk.f32.gmra.mxu1 %vm437_vm2, %v1405_v46 }
  0x80   : > { %2709 = vmatmul.msk.f32.gmra.mxu2 %vm437_vm2, %v1408_v54  ;;  %2611 = vmatmul.msk.f32.gmra.mxu0 %vm437_vm2, %v1404_v43  ;;  %v3172_v43 = vld [vmem:[#allocation2 + $0x180] sm:$0xff] }
  0x81   : > { %2647 = vmatmul.msk.f32.gmra.mxu3 %vm437_vm2, %v3066_v55 }
  0x87   : > { %2660 = vmatmul.msk.f32.gmra.mxu1 %vm437_vm2, %v1406_v48 }
  0x88   : > { %2710 = vmatmul.msk.f32.gmra.mxu2 %vm437_vm2, %v1409_v56  ;;  %2612 = vmatmul.msk.f32.gmra.mxu0 %vm437_vm2, %v1405_v46 }
  0x89   : > { %2686 = vmatmul.msk.f32.vlgmr.msrb.gmra.mxu3 %vm437_vm2, %v2994_v30 }
  0x8f   : > { %2661 = vmatmul.msk.f32.gmra.mxu1 %vm437_vm2, %v1407_v51 }
  0x90   : > { %2711 = vmatmul.msk.f32.gmra.mxu2 %vm437_vm2, %v1410_v58  ;;  %2613 = vmatmul.msk.f32.gmra.mxu0 %vm437_vm2, %v1406_v48 }
  0x91   : > { %2687 = vmatmul.msk.f32.gmra.mxu3 %vm437_vm2, %v3001_v34 }
  0x97   : > { %2662 = vmatmul.msk.f32.gmra.mxu1 %vm437_vm2, %v1408_v54 }
  0x98   : > { %2712 = vmatmul.msk.f32.gmra.mxu2 %vm437_vm2, %v1411_v60  ;;  %2614 = vmatmul.msk.f32.gmra.mxu0 %vm437_vm2, %v1407_v51 }
  0x99   : > { %2688 = vmatmul.msk.f32.gmra.mxu3 %vm437_vm2, %v3012_v38  ;;  %v3167_v38 = vld [vmem:[#allocation2 + $0xc8] sm:$0xff] }
  0x9e   : > { %v811_v62 = vpop.f32.mrf.mxu3 }
  0x9f   : > { %2663 = vmatmul.msk.f32.gmra.mxu1 %vm437_vm2, %v1409_v56  ;;  %884 = vst.msk [vmem:[#allocation3 + $0x120] sm:$0xff] %vm847_vm4, %v811_v62 }
  0xa0   : > { %2713 = vmatmul.msk.f32.gmra.mxu2 %vm437_vm2, %v1412_v61  ;;  %2615 = vmatmul.msk.f32.gmra.mxu0 %vm437_vm2, %v1408_v54 }
  0xa1   : > { %2689 = vmatmul.msk.f32.gmra.mxu3 %vm437_vm2, %v3022_v41 }
  0xa5   : > { %v703_v1 = vpop.f32.mrf.mxu0 }
  0xa6   : > { %848 = vst.msk [vmem:[#allocation3] sm:$0xff] %vm847_vm4, %v703_v1 }
  0xa7   : > { %2664 = vmatmul.msk.f32.gmra.mxu1 %vm437_vm2, %v1410_v58 }
  0xa8   : > { %2714 = vmatmul.msk.f32.gmra.mxu2 %vm437_vm2, %v3100_v0  ;;  %2616 = vmatmul.msk.f32.gmra.mxu0 %vm437_vm2, %v1409_v56  ;;  %v1110_v7 = vpop.f32.mrf.mxu1  ;;  %v422_v56 = vld [vmem:[%s2883_s28 + $0x90] sm:$0xff] }
  0xa9   : > { %2690 = vmatmul.msk.f32.gmra.mxu3 %vm437_vm2, %v3032_v44  ;;  %456 = vst.msk [vmem:[#allocation2 + $0xf1] sm:$0xff] %vm437_vm2, %v422_v56 }
  0xac   : > { %v814_v3 = vpop.f32.mrf.mxu3 }
  0xad   : > { %v706_v6 = vpop.f32.mrf.mxu0  ;;  %v1254_v8 = vld [vmem:[#allocation3] sm:$0xff]  ;;  %885 = vst.msk [vmem:[#allocation3 + $0x128] sm:$0xff] %vm847_vm4, %v814_v3 }
  0xae   : > { %849 = vst.msk [vmem:[#allocation3 + $0x8] sm:$0xff] %vm847_vm4, %v706_v6  ;;  %v1302_v9 = vadd.f32 %v1254_v8, %v1110_v7  ;;  %v423_v7 = vld [vmem:[%s2883_s28 + $0x98] sm:$0xff] }
  0xaf   : > { %2665 = vmatmul.msk.f32.gmra.mxu1 %vm437_vm2, %v1411_v60  ;;  %v1613_v14 = vpop.f32.mrf.mxu2  ;;  %457 = vst.msk [vmem:[#allocation2 + $0xf9] sm:$0xff] %vm437_vm2, %v423_v7 }
  0xb0   : > { %2715 = vmatmul.msk.f32.gmra.mxu2 %vm437_vm2, %v3112_v5  ;;  %1350 = vst.msk [vmem:[#allocation3] sm:$0xff] %vm847_vm4, %v1302_v9  ;;  %2617 = vmatmul.msk.f32.gmra.mxu0 %vm437_vm2, %v1410_v58 }
  0xb1   : > { %2691 = vmatmul.msk.f32.gmra.mxu3 %vm437_vm2, %v3041_v47 }
  0xb4   : > { %v817_v10 = vpop.f32.mrf.mxu3 }
  0xb5   : > { %v709_v13 = vpop.f32.mrf.mxu0  ;;  %886 = vst.msk [vmem:[#allocation3 + $0x130] sm:$0xff] %vm847_vm4, %v817_v10  ;;  %v1255_v17 = vld [vmem:[#allocation3 + $0x8] sm:$0xff] }
  0xb6   : > { %850 = vst.msk [vmem:[#allocation3 + $0x10] sm:$0xff] %vm847_vm4, %v709_v13 }
  0xb7   : > { %2666 = vmatmul.msk.f32.gmra.mxu1 %vm437_vm2, %v1412_v61  ;;  %v1757_v15 = vld [vmem:[#allocation3] sm:$0xff] }
  0xb8   : > { %2716 = vmatmul.msk.f32.gmra.mxu2 %vm437_vm2, %v3125_v12  ;;  %v1805_v16 = vadd.f32 %v1757_v15, %v1613_v14  ;;  %2618 = vmatmul.msk.f32.gmra.mxu0 %vm437_vm2, %v1411_v60 }
  0xb9   : > { %2692 = vmatmul.msk.f32.gmra.mxu3 %vm437_vm2, %v3048_v49 }
  0xba   : > { %1853 = vst.msk [vmem:[#allocation3] sm:$0xff] %vm847_vm4, %v1805_v16  ;;  %v3220_v16 = vld [vmem:[#allocation2 + $0x190] sm:$0xff] }
  0xbc   : > { %v1113_v19 = vpop.f32.mrf.mxu1 }
  0xbd   : > { %v1303_v20 = vadd.f32 %v1255_v17, %v1113_v19  ;;  %v712_v22 = vpop.f32.mrf.mxu0  ;;  %v1256_v23 = vld [vmem:[#allocation3 + $0x10] sm:$0xff] }
  0xbe   : > { %851 = vst.msk [vmem:[#allocation3 + $0x18] sm:$0xff] %vm847_vm4, %v712_v22 }
  0xbf   : > { %1351 = vst.msk [vmem:[#allocation3 + $0x8] sm:$0xff] %vm847_vm4, %v1303_v20  ;;  %2667 = vmatmul.msk.f32.gmra.mxu1 %vm437_vm2, %v3100_v0 }
  0xc0   : > { %2717 = vmatmul.msk.f32.gmra.mxu2 %vm437_vm2, %v3139_v21  ;;  %2619 = vmatmul.msk.f32.gmra.mxu0 %vm437_vm2, %v1412_v61 }
  0xc1   : > { %2693 = vmatmul.msk.f32.gmra.mxu3 %vm437_vm2, %v3057_v52  ;;  %v3169_v42 = vld [vmem:[#allocation3] sm:$0xff] }
  0xc2   : > { %v2207_v48 = vrot.slane %v3169_v42, 2  ;;  %v1998_v51 = vrot.slane %v3169_v42, 1 }
  0xc3   : > { %v1616_v25 = vpop.f32.mrf.mxu2 }
  0xc4   : > { %v1116_v26 = vpop.f32.mrf.mxu1  ;;  %v820_v27 = vpop.f32.mrf.mxu3 }
  0xc5   : > { %v1304_v28 = vadd.f32 %v1256_v23, %v1116_v26  ;;  %887 = vst.msk [vmem:[#allocation3 + $0x138] sm:$0xff] %vm847_vm4, %v820_v27  ;;  %v715_v30 = vpop.f32.mrf.mxu0  ;;  %v1257_v33 = vld [vmem:[#allocation3 + $0x18] sm:$0xff]  ;;  %v3235_v26 = vld [vmem:[#allocation2 + $0xe0] sm:$0xff] }
  0xc6   : > { %v1758_v31 = vld [vmem:[#allocation3 + $0x8] sm:$0xff]  ;;  %852 = vst.msk [vmem:[#allocation3 + $0x20] sm:$0xff] %vm847_vm4, %v715_v30 }
  0xc7   : > { %1352 = vst.msk [vmem:[#allocation3 + $0x10] sm:$0xff] %vm847_vm4, %v1304_v28  ;;  %v1806_v32 = vadd.f32 %v1758_v31, %v1616_v25  ;;  %2668 = vmatmul.msk.f32.gmra.mxu1 %vm437_vm2, %v3112_v5 }
  0xc8   : > { %2718 = vmatmul.msk.f32.gmra.mxu2 %vm437_vm2, %v3153_v29  ;;  %2620 = vmatmul.msk.f32.gmra.mxu0 %vm437_vm2, %v3100_v0 }
  0xc9   : > { %1854 = vst.msk [vmem:[#allocation3 + $0x8] sm:$0xff] %vm847_vm4, %v1806_v32  ;;  %2694 = vmatmul.msk.f32.gmra.mxu3 %vm437_vm2, %v3066_v55 }
  0xcb   : > { %v1619_v34 = vpop.f32.mrf.mxu2 }
  0xcc   : > { %v1119_v35 = vpop.f32.mrf.mxu1  ;;  %v823_v36 = vpop.f32.mrf.mxu3 }
  0xcd   : > { %v1305_v37 = vadd.f32 %v1257_v33, %v1119_v35  ;;  %888 = vst.msk [vmem:[#allocation3 + $0x140] sm:$0xff] %vm847_vm4, %v823_v36  ;;  %v718_v39 = vpop.f32.mrf.mxu0  ;;  %v1258_v54 = vld [vmem:[#allocation3 + $0x20] sm:$0xff]  ;;  %v424_v35 = vld [vmem:[%s2883_s28 + $0xa0] sm:$0xff] }
  0xce   : > { %v1759_v40 = vld [vmem:[#allocation3 + $0x10] sm:$0xff]  ;;  %853 = vst.msk [vmem:[#allocation3 + $0x28] sm:$0xff] %vm847_vm4, %v718_v39 }
  0xcf   : > { %1353 = vst.msk [vmem:[#allocation3 + $0x18] sm:$0xff] %vm847_vm4, %v1305_v37  ;;  %v1807_v45 = vadd.f32 %v1759_v40, %v1619_v34  ;;  %2669 = vmatmul.msk.f32.gmra.mxu1 %vm437_vm2, %v3125_v12 }
  0xd0   : > { %2719 = vmatmul.msk.f32.gmra.mxu2 %vm437_vm2, %v3167_v38  ;;  %v3179_v46 = vld [vmem:[#allocation3 + $0x8] sm:$0xff]  ;;  %2621 = vmatmul.msk.f32.gmra.mxu0 %vm437_vm2, %v3112_v5  ;;  %458 = vst.msk [vmem:[#allocation2 + $0x109] sm:$0xff] %vm437_vm2, %v424_v35 }
  0xd1   : > { %1855 = vst.msk [vmem:[#allocation3 + $0x10] sm:$0xff] %vm847_vm4, %v1807_v45  ;;  %v2208_v50 = vrot.slane %v3179_v46, 2  ;;  %v1999_v53 = vrot.slane %v3179_v46, 1  ;;  %2695 = vmatmul.msk.f32.gmra.mxu3 %vm437_vm2, %v3172_v43  ;;  %v3259_v45 = vld [vmem:[#allocation2 + $0xe8] sm:$0xff] }
  0xd3   : > { %v2209_v57 = vsel %vm2206_vm5, %v2207_v48, %v2208_v50  ;;  %v2000_v58 = vsel %vm1997_vm6, %v1998_v51, %v1999_v53  ;;  %v1622_v59 = vpop.f32.mrf.mxu2 }
  0xd4   : > { %2287 = vrot.lane.b32.xlu2 %v2209_v57, %s2811_s6  ;;  %2078 = vrot.lane.b32.xlu0 %v2000_v58, %s2812_s7  ;;  %v1122_v60 = vpop.f32.mrf.mxu1  ;;  %v826_v61 = vpop.f32.mrf.mxu3  ;;  %v425_v58 = vld [vmem:[%s2883_s28 + $0xa8] sm:$0xff] }
  0xd5   : > { %v1306_v62 = vadd.f32 %v1258_v54, %v1122_v60  ;;  %889 = vst.msk [vmem:[#allocation3 + $0x148] sm:$0xff] %vm847_vm4, %v826_v61  ;;  %v721_v0 = vpop.f32.mrf.mxu0  ;;  %v1259_v6 = vld [vmem:[#allocation3 + $0x28] sm:$0xff] }
  0xd6   : > { %v1760_v1 = vld [vmem:[#allocation3 + $0x18] sm:$0xff]  ;;  %854 = vst.msk [vmem:[#allocation3 + $0x30] sm:$0xff] %vm847_vm4, %v721_v0 }
  0xd7   : > { %1354 = vst.msk [vmem:[#allocation3 + $0x20] sm:$0xff] %vm847_vm4, %v1306_v62  ;;  %v1808_v3 = vadd.f32 %v1760_v1, %v1622_v59  ;;  %2670 = vmatmul.msk.f32.gmra.mxu1 %vm437_vm2, %v3139_v21  ;;  %v3281_v1 = vld [vmem:[#allocation2 + $0xf0] sm:$0xff] }
  0xd8   : > { %2720 = vmatmul.msk.f32.gmra.mxu2 %vm437_vm2, %v3197_v63  ;;  %v1903_v4 = vld [vmem:[#allocation3 + $0x10] sm:$0xff]  ;;  %2622 = vmatmul.msk.f32.gmra.mxu0 %vm437_vm2, %v3125_v12  ;;  %v3217_v12 = vld [vmem:[#allocation2 + $0xd8] sm:$0xff]  ;;  %459 = vst.msk [vmem:[#allocation2 + $0x111] sm:$0xff] %vm437_vm2, %v425_v58 }
  0xd9   : > { %1856 = vst.msk [vmem:[#allocation3 + $0x18] sm:$0xff] %vm847_vm4, %v1808_v3  ;;  %v2001_v5 = vrot.slane %v1903_v4, 1  ;;  %2696 = vmatmul.msk.f32.gmra.mxu3 %vm437_vm2, %v3200_v2  ;;  %v2210_v18 = vrot.slane %v1903_v4, 2 }
  0xdb   : > { %v2002_v8 = vsel %vm1997_vm6, %v1999_v53, %v2001_v5  ;;  %v1625_v9 = vpop.f32.mrf.mxu2  ;;  %v2211_v20 = vsel %vm2206_vm5, %v2208_v50, %v2210_v18 }
  0xdc   : > { %2080 = vrot.lane.b32.xlu0 %v2002_v8, %s2812_s7  ;;  %v1125_v10 = vpop.f32.mrf.mxu1  ;;  %v829_v11 = vpop.f32.mrf.mxu3 }
  0xdd   : > { %v1307_v13 = vadd.f32 %v1259_v6, %v1125_v10  ;;  %890 = vst.msk [vmem:[#allocation3 + $0x150] sm:$0xff] %vm847_vm4, %v829_v11  ;;  %v724_v14 = vpop.f32.mrf.mxu0  ;;  %v1260_v19 = vld [vmem:[#allocation3 + $0x30] sm:$0xff] }
  0xde   : > { %v1761_v15 = vld [vmem:[#allocation3 + $0x20] sm:$0xff]  ;;  %855 = vst.msk [vmem:[#allocation3 + $0x38] sm:$0xff] %vm847_vm4, %v724_v14 }
  0xdf   : > { %1355 = vst.msk [vmem:[#allocation3 + $0x28] sm:$0xff] %vm847_vm4, %v1307_v13  ;;  %v1809_v17 = vadd.f32 %v1761_v15, %v1625_v9  ;;  %2671 = vmatmul.msk.f32.gmra.mxu1 %vm437_vm2, %v3153_v29  ;;  %v3297_v13 = vld [vmem:[#allocation2 + $0xf8] sm:$0xff] }
  0xe0   : > { %2721 = vmatmul.msk.f32.gmra.mxu2 %vm437_vm2, %v3217_v12  ;;  %2623 = vmatmul.msk.f32.gmra.mxu0 %vm437_vm2, %v3139_v21  ;;  %v3237_v28 = vld [vmem:[#allocation3 + $0x18] sm:$0xff] }
  0xe1   : > { %1857 = vst.msk [vmem:[#allocation3 + $0x20] sm:$0xff] %vm847_vm4, %v1809_v17  ;;  %2697 = vmatmul.msk.f32.gmra.mxu3 %vm437_vm2, %v3220_v16  ;;  %v2003_v32 = vrot.slane %v3237_v28, 1  ;;  %v2212_v54 = vrot.slane %v3237_v28, 2 }
  0xe3   : > { %v1628_v22 = vpop.f32.mrf.mxu2 }
  0xe4   : > { %2289 = vrot.lane.b32.xlu0 %v2211_v20, %s2811_s6  ;;  %v1128_v23 = vpop.f32.mrf.mxu1  ;;  %v832_v24 = vpop.f32.mrf.mxu3 }
  0xe5   : > { %v1308_v25 = vadd.f32 %v1260_v19, %v1128_v23  ;;  %891 = vst.msk [vmem:[#allocation3 + $0x158] sm:$0xff] %vm847_vm4, %v832_v24  ;;  %v727_v21 = vpop.f32.mrf.mxu0  ;;  %v1261_v34 = vld [vmem:[#allocation3 + $0x38] sm:$0xff] }
  0xe6   : > { %v1762_v27 = vld [vmem:[#allocation3 + $0x28] sm:$0xff]  ;;  %856 = vst.msk [vmem:[#allocation3 + $0x40] sm:$0xff] %vm847_vm4, %v727_v21 }
  0xe7   : > { %1356 = vst.msk [vmem:[#allocation3 + $0x30] sm:$0xff] %vm847_vm4, %v1308_v25  ;;  %v1810_v30 = vadd.f32 %v1762_v27, %v1628_v22  ;;  %2672 = vmatmul.msk.f32.gmra.mxu1 %vm437_vm2, %v3167_v38 }
  0xe8   : > { %2722 = vmatmul.msk.f32.gmra.mxu2 %vm437_vm2, %v3235_v26  ;;  %v3245_v31 = vld [vmem:[#allocation3 + $0x20] sm:$0xff]  ;;  %2624 = vmatmul.msk.f32.gmra.mxu0 %vm437_vm2, %v3153_v29 }
  0xe9   : > { %1858 = vst.msk [vmem:[#allocation3 + $0x28] sm:$0xff] %vm847_vm4, %v1810_v30  ;;  %v2004_v33 = vrot.slane %v3245_v31, 1  ;;  %2736 = vmatmul.msk.f32.vlgmr.msra.gmra.mxu3 %vm437_vm2, %v3022_v41  ;;  %v2213_v51 = vrot.slane %v3245_v31, 2 }
  0xeb   : > { %v2005_v36 = vsel %vm1997_vm6, %v2003_v32, %v2004_v33  ;;  %v1631_v37 = vpop.f32.mrf.mxu2  ;;  %v2214_v59 = vsel %vm2206_vm5, %v2212_v54, %v2213_v51  ;;  %v3324_v32 = vld [vmem:[#allocation2 + $0x100] sm:$0xff] }
  0xec   : > { %v1131_v39 = vpop.f32.mrf.mxu1  ;;  %2082 = vrot.lane.b32.xlu1 %v2005_v36, %s2812_s7  ;;  %v835_v29 = vpop.f32.mrf.mxu3 }
  0xed   : > { %v1309_v40 = vadd.f32 %v1261_v34, %v1131_v39  ;;  %892 = vst.msk [vmem:[#allocation3 + $0x160] sm:$0xff] %vm847_vm4, %v835_v29  ;;  %v730_v48 = vpop.f32.mrf.mxu0  ;;  %v1262_v57 = vld [vmem:[#allocation3 + $0x40] sm:$0xff]  ;;  %v481_v29 = vld [vmem:[%s3333_s11] sm:$0xff] }
  0xee   : > { %v1763_v50 = vld [vmem:[#allocation3 + $0x30] sm:$0xff]  ;;  %857 = vst.msk [vmem:[#allocation3 + $0x48] sm:$0xff] %vm847_vm4, %v730_v48 }
  0xef   : > { %1357 = vst.msk [vmem:[#allocation3 + $0x38] sm:$0xff] %vm847_vm4, %v1309_v40  ;;  %v1811_v41 = vadd.f32 %v1763_v50, %v1631_v37  ;;  %2673 = vmatmul.msk.f32.gmra.mxu1 %vm437_vm2, %v3197_v63 }
  0xf0   : > { %2723 = vmatmul.msk.f32.gmra.mxu2 %vm437_vm2, %v3259_v45  ;;  %v1906_v53 = vld [vmem:[#allocation3 + $0x28] sm:$0xff]  ;;  %2625 = vmatmul.msk.f32.gmra.mxu0 %vm437_vm2, %v3167_v38 }
  0xf1   : > { %1859 = vst.msk [vmem:[#allocation3 + $0x30] sm:$0xff] %vm847_vm4, %v1811_v41  ;;  %v2215_v56 = vrot.slane %v1906_v53, 2  ;;  %2737 = vmatmul.msk.f32.gmra.mxu3 %vm437_vm2, %v3032_v44  ;;  %v2006_v5 = vrot.slane %v1906_v53, 1  ;;  %v484_v41 = vmul.f32 0.0, %v481_v29  ;;  %v1290_v53 = vld [vmem:[#allocation3 + $0x120] sm:$0xff] }
  0xf3   : > { %v2216_v60 = vsel %vm2206_vm5, %v2213_v51, %v2215_v56  ;;  %v1634_v61 = vpop.f32.mrf.mxu2  ;;  %v2007_v7 = vsel %vm1997_vm6, %v2004_v33, %v2006_v5  ;;  %487 = vst.msk [vmem:[#allocation2 + $0x199] sm:$0xff] %vm437_vm2, %v484_v41 }
  0xf4   : > { %v1134_v62 = vpop.f32.mrf.mxu1  ;;  %2291 = vrot.lane.b32.xlu1 %v2214_v59, %s2811_s6  ;;  %2293 = vrot.lane.b32.xlu2 %v2216_v60, %s2811_s6  ;;  %v838_v38 = vpop.f32.mrf.mxu3 }
  0xf5   : > { %v1310_v0 = vadd.f32 %v1262_v57, %v1134_v62  ;;  %893 = vst.msk [vmem:[#allocation3 + $0x168] sm:$0xff] %vm847_vm4, %v838_v38  ;;  %v733_v44 = vpop.f32.mrf.mxu0  ;;  %v1263_v6 = vld [vmem:[#allocation3 + $0x48] sm:$0xff]  ;;  %v3347_v57 = vld [vmem:[#allocation2 + $0x108] sm:$0xff] }
  0xf6   : > { %v1764_v3 = vld [vmem:[#allocation3 + $0x38] sm:$0xff]  ;;  %858 = vst.msk [vmem:[#allocation3 + $0x50] sm:$0xff] %vm847_vm4, %v733_v44 }
  0xf7   : > { %1358 = vst.msk [vmem:[#allocation3 + $0x40] sm:$0xff] %vm847_vm4, %v1310_v0  ;;  %v1812_v4 = vadd.f32 %v1764_v3, %v1634_v61  ;;  %2674 = vmatmul.msk.f32.gmra.mxu1 %vm437_vm2, %v3217_v12  ;;  %v482_v61 = vld [vmem:[%s3333_s11 + $0x8] sm:$0xff]  ;;  %v1291_v3 = vld [vmem:[#allocation3 + $0x128] sm:$0xff] }
  0xf8   : > { %2724 = vmatmul.msk.f32.gmra.mxu2 %vm437_vm2, %v3281_v1  ;;  %2626 = vmatmul.msk.f32.gmra.mxu0 %vm437_vm2, %v3197_v63  ;;  %v3299_v15 = vld [vmem:[#allocation3 + $0x30] sm:$0xff]  ;;  %v485_v38 = vmul.f32 0.0, %v482_v61 }
  0xf9   : > { %1860 = vst.msk [vmem:[#allocation3 + $0x38] sm:$0xff] %vm847_vm4, %v1812_v4  ;;  %2738 = vmatmul.msk.f32.gmra.mxu3 %vm437_vm2, %v3041_v47  ;;  %v2217_v18 = vrot.slane %v3299_v15, 2  ;;  %v2008_v20 = vrot.slane %v3299_v15, 1 }
  0xfa   : > { %488 = vst.msk [vmem:[#allocation2 + $0x1a1] sm:$0xff] %vm437_vm2, %v485_v38 }
  0xfb   : > { %v1637_v8 = vpop.f32.mrf.mxu2 }
  0xfc   : > { %v1137_v9 = vpop.f32.mrf.mxu1  ;;  %2084 = vrot.lane.b32.xlu1 %v2007_v7, %s2812_s7  ;;  %v841_v10 = vpop.f32.mrf.mxu3 }
  0xfd   : > { %v1311_v11 = vadd.f32 %v1263_v6, %v1137_v9  ;;  %894 = vst.msk [vmem:[#allocation3 + $0x170] sm:$0xff] %vm847_vm4, %v841_v10  ;;  %v736_v14 = vpop.f32.mrf.mxu0  ;;  %v1264_v23 = vld [vmem:[#allocation3 + $0x50] sm:$0xff]  ;;  %v3363_v6 = vld [vmem:[#allocation2 + $0x110] sm:$0xff] }
  0xfe   : > { %v1765_v63 = vld [vmem:[#allocation3 + $0x40] sm:$0xff]  ;;  %859 = vst.msk [vmem:[#allocation3 + $0x58] sm:$0xff] %vm847_vm4, %v736_v14 }
  0xff   : > { %1359 = vst.msk [vmem:[#allocation3 + $0x48] sm:$0xff] %vm847_vm4, %v1311_v11  ;;  %v1813_v47 = vadd.f32 %v1765_v63, %v1637_v8  ;;  %2675 = vmatmul.msk.f32.gmra.mxu1 %vm437_vm2, %v3235_v26 }
 0x100   : > { %2725 = vmatmul.msk.f32.gmra.mxu2 %vm437_vm2, %v3297_v13  ;;  %v3307_v17 = vld [vmem:[#allocation3 + $0x38] sm:$0xff]  ;;  %2627 = vmatmul.msk.f32.gmra.mxu0 %vm437_vm2, %v3217_v12 }
 0x101   : > { %1861 = vst.msk [vmem:[#allocation3 + $0x40] sm:$0xff] %vm847_vm4, %v1813_v47  ;;  %v2218_v19 = vrot.slane %v3307_v17, 2  ;;  %v2009_v22 = vrot.slane %v3307_v17, 1  ;;  %2739 = vmatmul.msk.f32.gmra.mxu3 %vm437_vm2, %v3048_v49 }
 0x103   : > { %v2219_v24 = vsel %vm2206_vm5, %v2217_v18, %v2218_v19  ;;  %v2010_v25 = vsel %vm1997_vm6, %v2008_v20, %v2009_v22  ;;  %v1640_v21 = vpop.f32.mrf.mxu2 }
 0x104   : > { %v1140_v12 = vpop.f32.mrf.mxu1  ;;  %2295 = vrot.lane.b32.xlu0 %v2219_v24, %s2811_s6  ;;  %2086 = vrot.lane.b32.xlu2 %v2010_v25, %s2812_s7  ;;  %v844_v27 = vpop.f32.mrf.mxu3 }
 0x105   : > { %v1312_v30 = vadd.f32 %v1264_v23, %v1140_v12  ;;  %895 = vst.msk [vmem:[#allocation3 + $0x178] sm:$0xff] %vm847_vm4, %v844_v27  ;;  %v739_v33 = vpop.f32.mrf.mxu0  ;;  %v1265_v39 = vld [vmem:[#allocation3 + $0x58] sm:$0xff]  ;;  %v1292_v23 = vld [vmem:[#allocation3 + $0x130] sm:$0xff] }
 0x106   : > { %v1766_v49 = vld [vmem:[#allocation3 + $0x48] sm:$0xff]  ;;  %860 = vst.msk [vmem:[#allocation3 + $0x60] sm:$0xff] %vm847_vm4, %v739_v33 }
 0x107   : > { %1360 = vst.msk [vmem:[#allocation3 + $0x50] sm:$0xff] %vm847_vm4, %v1312_v30  ;;  %v1814_v34 = vadd.f32 %v1766_v49, %v1640_v21  ;;  %2676 = vmatmul.msk.f32.gmra.mxu1 %vm437_vm2, %v3259_v45  ;;  %v3390_v21 = vld [vmem:[#allocation2 + $0x118] sm:$0xff] }
 0x108   : > { %2726 = vmatmul.msk.f32.gmra.mxu2 %vm437_vm2, %v3324_v32  ;;  %v1909_v35 = vld [vmem:[#allocation3 + $0x40] sm:$0xff]  ;;  %2628 = vmatmul.msk.f32.gmra.mxu0 %vm437_vm2, %v3235_v26 }
 0x109   : > { %1862 = vst.msk [vmem:[#allocation3 + $0x48] sm:$0xff] %vm847_vm4, %v1814_v34  ;;  %v2220_v36 = vrot.slane %v1909_v35, 2  ;;  %v2011_v37 = vrot.slane %v1909_v35, 1  ;;  %2740 = vmatmul.msk.f32.gmra.mxu3 %vm437_vm2, %v3057_v52 }
 0x10b   : > { %v2221_v40 = vsel %vm2206_vm5, %v2218_v19, %v2220_v36  ;;  %v2012_v48 = vsel %vm1997_vm6, %v2009_v22, %v2011_v37  ;;  %v1643_v50 = vpop.f32.mrf.mxu2 }
 0x10c   : > { %v1143_v51 = vpop.f32.mrf.mxu1  ;;  %2297 = vrot.lane.b32.xlu1 %v2221_v40, %s2811_s6  ;;  %2088 = vrot.lane.b32.xlu2 %v2012_v48, %s2812_s7  ;;  %v1218_v26 = vpop.f32.mrf.mxu3 }
 0x10d   : > { %v1313_v54 = vadd.f32 %v1265_v39, %v1143_v51  ;;  %v1338_v56 = vadd.f32 %v1290_v53, %v1218_v26  ;;  %v742_v52 = vpop.f32.mrf.mxu0  ;;  %v1266_v60 = vld [vmem:[#allocation3 + $0x60] sm:$0xff] }
 0x10e   : > { %v1767_v58 = vld [vmem:[#allocation3 + $0x50] sm:$0xff]  ;;  %861 = vst.msk [vmem:[#allocation3 + $0x68] sm:$0xff] %vm847_vm4, %v742_v52  ;;  %v1294_v52 = vld [vmem:[#allocation3 + $0x140] sm:$0xff] }
 0x10f   : > { %1361 = vst.msk [vmem:[#allocation3 + $0x58] sm:$0xff] %vm847_vm4, %v1313_v54  ;;  %v1815_v59 = vadd.f32 %v1767_v58, %v1643_v50  ;;  %2677 = vmatmul.msk.f32.gmra.mxu1 %vm437_vm2, %v3281_v1  ;;  %v3408_v50 = vld [vmem:[#allocation2 + $0x120] sm:$0xff] }
 0x110   : > { %1386 = vst.msk [vmem:[#allocation3 + $0x120] sm:$0xff] %vm847_vm4, %v1338_v56  ;;  %2727 = vmatmul.msk.f32.gmra.mxu2 %vm437_vm2, %v3347_v57  ;;  %2629 = vmatmul.msk.f32.gmra.mxu0 %vm437_vm2, %v3259_v45  ;;  %v3366_v8 = vld [vmem:[#allocation3 + $0x48] sm:$0xff] }
 0x111   : > { %1863 = vst.msk [vmem:[#allocation3 + $0x50] sm:$0xff] %vm847_vm4, %v1815_v59  ;;  %2741 = vmatmul.msk.f32.gmra.mxu3 %vm437_vm2, %v3066_v55  ;;  %v2222_v10 = vrot.slane %v3366_v8, 2  ;;  %v2013_v14 = vrot.slane %v3366_v8, 1 }
 0x113   : > { %v1646_v62 = vpop.f32.mrf.mxu2 }
 0x114   : > { %v1146_v0 = vpop.f32.mrf.mxu1  ;;  %v1221_v44 = vpop.f32.mrf.mxu3 }
 0x115   : > { %v1314_v4 = vadd.f32 %v1266_v60, %v1146_v0  ;;  %v1339_v5 = vadd.f32 %v1291_v3, %v1221_v44  ;;  %v745_v7 = vpop.f32.mrf.mxu0  ;;  %v1267_v47 = vld [vmem:[#allocation3 + $0x68] sm:$0xff]  ;;  %v3422_v60 = vld [vmem:[#allocation2 + $0x128] sm:$0xff] }
 0x116   : > { %v1768_v45 = vld [vmem:[#allocation3 + $0x58] sm:$0xff]  ;;  %862 = vst.msk [vmem:[#allocation3 + $0x70] sm:$0xff] %vm847_vm4, %v745_v7 }
 0x117   : > { %1362 = vst.msk [vmem:[#allocation3 + $0x60] sm:$0xff] %vm847_vm4, %v1314_v4  ;;  %v1816_v55 = vadd.f32 %v1768_v45, %v1646_v62  ;;  %2678 = vmatmul.msk.f32.gmra.mxu1 %vm437_vm2, %v3297_v13 }
 0x118   : > { %1387 = vst.msk [vmem:[#allocation3 + $0x128] sm:$0xff] %vm847_vm4, %v1339_v5  ;;  %2728 = vmatmul.msk.f32.gmra.mxu2 %vm437_vm2, %v3363_v6  ;;  %v3375_v9 = vld [vmem:[#allocation3 + $0x50] sm:$0xff]  ;;  %2630 = vmatmul.msk.f32.gmra.mxu0 %vm437_vm2, %v3281_v1 }
 0x119   : > { %1864 = vst.msk [vmem:[#allocation3 + $0x58] sm:$0xff] %vm847_vm4, %v1816_v55  ;;  %v2223_v11 = vrot.slane %v3375_v9, 2  ;;  %v2014_v63 = vrot.slane %v3375_v9, 1  ;;  %2742 = vmatmul.msk.f32.gmra.mxu3 %vm437_vm2, %v3172_v43 }
 0x11b   : > { %v2224_v18 = vsel %vm2206_vm5, %v2222_v10, %v2223_v11  ;;  %v2015_v19 = vsel %vm1997_vm6, %v2013_v14, %v2014_v63  ;;  %v1649_v20 = vpop.f32.mrf.mxu2  ;;  %v1295_v14 = vld [vmem:[#allocation3 + $0x148] sm:$0xff] }
 0x11c   : > { %v1149_v1 = vpop.f32.mrf.mxu1  ;;  %2299 = vrot.lane.b32.xlu2 %v2224_v18, %s2811_s6  ;;  %2090 = vrot.lane.b32.xlu0 %v2015_v19, %s2812_s7  ;;  %v1224_v22 = vpop.f32.mrf.mxu3  ;;  %v3447_v18 = vld [vmem:[#allocation2 + $0x130] sm:$0xff] }
 0x11d   : > { %v1315_v24 = vadd.f32 %v1267_v47, %v1149_v1  ;;  %v1340_v25 = vadd.f32 %v1292_v23, %v1224_v22  ;;  %v748_v12 = vpop.f32.mrf.mxu0  ;;  %v1268_v34 = vld [vmem:[#allocation3 + $0x70] sm:$0xff] }
 0x11e   : > { %v1769_v27 = vld [vmem:[#allocation3 + $0x60] sm:$0xff]  ;;  %863 = vst.msk [vmem:[#allocation3 + $0x78] sm:$0xff] %vm847_vm4, %v748_v12  ;;  %v1445_v1 = vld [vmem:[#allocation2 + $0x1a0] sm:$0xff] }
 0x11f   : > { %1363 = vst.msk [vmem:[#allocation3 + $0x68] sm:$0xff] %vm847_vm4, %v1315_v24  ;;  %v1817_v43 = vadd.f32 %v1769_v27, %v1649_v20  ;;  %2679 = vmatmul.msk.f32.gmra.mxu1 %vm437_vm2, %v3324_v32 }
 0x120   : > { %1388 = vst.msk [vmem:[#allocation3 + $0x130] sm:$0xff] %vm847_vm4, %v1340_v25  ;;  %2729 = vmatmul.msk.f32.gmra.mxu2 %vm437_vm2, %v3390_v21  ;;  %v1912_v30 = vld [vmem:[#allocation3 + $0x58] sm:$0xff]  ;;  %2631 = vmatmul.msk.f32.gmra.mxu0 %vm437_vm2, %v3297_v13 }
 0x121   : > { %1865 = vst.msk [vmem:[#allocation3 + $0x60] sm:$0xff] %vm847_vm4, %v1817_v43  ;;  %v2225_v33 = vrot.slane %v1912_v30, 2  ;;  %v2016_v49 = vrot.slane %v1912_v30, 1  ;;  %2743 = vmatmul.msk.f32.gmra.mxu3 %vm437_vm2, %v3200_v2  ;;  %v1293_v13 = vld [vmem:[#allocation3 + $0x138] sm:$0xff] }
 0x123   : > { %v2226_v35 = vsel %vm2206_vm5, %v2223_v11, %v2225_v33  ;;  %v2017_v36 = vsel %vm1997_vm6, %v2014_v63, %v2016_v49  ;;  %v1652_v37 = vpop.f32.mrf.mxu2 }
 0x124   : > { %v1152_v39 = vpop.f32.mrf.mxu1  ;;  %2301 = vrot.lane.b32.xlu0 %v2226_v35, %s2811_s6  ;;  %2092 = vrot.lane.b32.xlu1 %v2017_v36, %s2812_s7  ;;  %v1227_v29 = vpop.f32.mrf.mxu3  ;;  %v1432_v36 = vld [vmem:[#allocation2 + $0x138] sm:$0xff] }
 0x125   : > { %v1316_v40 = vadd.f32 %v1268_v34, %v1152_v39  ;;  %v1341_v48 = vadd.f32 %v1293_v13, %v1227_v29  ;;  %v751_v41 = vpop.f32.mrf.mxu0  ;;  %v1269_v26 = vld [vmem:[#allocation3 + $0x78] sm:$0xff]  ;;  %v1296_v34 = vld [vmem:[#allocation3 + $0x150] sm:$0xff] }
 0x126   : > { %v1770_v51 = vld [vmem:[#allocation3 + $0x68] sm:$0xff]  ;;  %864 = vst.msk [vmem:[#allocation3 + $0x80] sm:$0xff] %vm847_vm4, %v751_v41  ;;  %v1446_v29 = vld [vmem:[#allocation2 + $0x1a8] sm:$0xff] }
 0x127   : > { %1364 = vst.msk [vmem:[#allocation3 + $0x70] sm:$0xff] %vm847_vm4, %v1316_v40  ;;  %v1818_v2 = vadd.f32 %v1770_v51, %v1652_v37  ;;  %2680 = vmatmul.msk.f32.gmra.mxu1 %vm437_vm2, %v3347_v57 }
 0x128   : > { %1389 = vst.msk [vmem:[#allocation3 + $0x138] sm:$0xff] %vm847_vm4, %v1341_v48  ;;  %2730 = vmatmul.msk.f32.gmra.mxu2 %vm437_vm2, %v3408_v50  ;;  %2632 = vmatmul.msk.f32.gmra.mxu0 %vm437_vm2, %v3324_v32  ;;  %v3424_v38 = vld [vmem:[#allocation3 + $0x60] sm:$0xff]  ;;  %v1444_v32 = vld [vmem:[#allocation2 + $0x198] sm:$0xff] }
 0x129   : > { %1866 = vst.msk [vmem:[#allocation3 + $0x68] sm:$0xff] %vm847_vm4, %v1818_v2  ;;  %2744 = vmatmul.msk.f32.gmra.mxu3 %vm437_vm2, %v3220_v16  ;;  %v2227_v44 = vrot.slane %v3424_v38, 2  ;;  %v2018_v4 = vrot.slane %v3424_v38, 1  ;;  %v1297_v2 = vld [vmem:[#allocation3 + $0x158] sm:$0xff] }
 0x12b   : > { %v1655_v53 = vpop.f32.mrf.mxu2 }
 0x12c   : > { %v1155_v54 = vpop.f32.mrf.mxu1  ;;  %v1230_v56 = vpop.f32.mrf.mxu3 }
 0x12d   : > { %v1317_v58 = vadd.f32 %v1269_v26, %v1155_v54  ;;  %v1342_v59 = vadd.f32 %v1294_v52, %v1230_v56  ;;  %v754_v61 = vpop.f32.mrf.mxu0  ;;  %v1270_v7 = vld [vmem:[#allocation3 + $0x80] sm:$0xff] }
 0x12e   : > { %v1771_v62 = vld [vmem:[#allocation3 + $0x70] sm:$0xff]  ;;  %865 = vst.msk [vmem:[#allocation3 + $0x88] sm:$0xff] %vm847_vm4, %v754_v61  ;;  %v2288_v61 = vpop.permute.xlu2 %2287 }
 0x12f   : > { %1365 = vst.msk [vmem:[#allocation3 + $0x78] sm:$0xff] %vm847_vm4, %v1317_v58  ;;  %v1819_v0 = vadd.f32 %v1771_v62, %v1655_v53  ;;  %2681 = vmatmul.msk.f32.gmra.mxu1 %vm437_vm2, %v3363_v6 }
 0x130   : > { %1390 = vst.msk [vmem:[#allocation3 + $0x140] sm:$0xff] %vm847_vm4, %v1342_v59  ;;  %2731 = vmatmul.msk.f32.gmra.mxu2 %vm437_vm2, %v3422_v60  ;;  %v3433_v16 = vld [vmem:[#allocation3 + $0x68] sm:$0xff]  ;;  %2633 = vmatmul.msk.f32.gmra.mxu0 %vm437_vm2, %v3347_v57 }
 0x131   : > { %1867 = vst.msk [vmem:[#allocation3 + $0x70] sm:$0xff] %vm847_vm4, %v1819_v0  ;;  %v2228_v3 = vrot.slane %v3433_v16, 2  ;;  %v2019_v5 = vrot.slane %v3433_v16, 1  ;;  %2745 = vmatmul.msk.f32.gmra.mxu3 %vm437_vm2, %v1444_v32 }
 0x133   : > { %v2229_v45 = vsel %vm2206_vm5, %v2227_v44, %v2228_v3  ;;  %v2020_v55 = vsel %vm1997_vm6, %v2018_v4, %v2019_v5  ;;  %v1658_v10 = vpop.f32.mrf.mxu2 }
 0x134   : > { %v1158_v11 = vpop.f32.mrf.mxu1  ;;  %2303 = vrot.lane.b32.xlu1 %v2229_v45, %s2811_s6  ;;  %2094 = vrot.lane.b32.xlu2 %v2020_v55, %s2812_s7  ;;  %v1233_v57 = vpop.f32.mrf.mxu3 }
 0x135   : > { %v1318_v63 = vadd.f32 %v1270_v7, %v1158_v11  ;;  %v1343_v47 = vadd.f32 %v1295_v14, %v1233_v57  ;;  %v757_v19 = vpop.f32.mrf.mxu0  ;;  %v1271_v12 = vld [vmem:[#allocation3 + $0x88] sm:$0xff]  ;;  %v1434_v14 = vld [vmem:[#allocation2 + $0x148] sm:$0xff] }
 0x136   : > { %v1772_v20 = vld [vmem:[#allocation3 + $0x78] sm:$0xff]  ;;  %866 = vst.msk [vmem:[#allocation3 + $0x90] sm:$0xff] %vm847_vm4, %v757_v19 }
 0x137   : > { %1366 = vst.msk [vmem:[#allocation3 + $0x80] sm:$0xff] %vm847_vm4, %v1318_v63  ;;  %v1820_v22 = vadd.f32 %v1772_v20, %v1658_v10  ;;  %2682 = vmatmul.msk.f32.gmra.mxu1 %vm437_vm2, %v3390_v21  ;;  %v1298_v10 = vld [vmem:[#allocation3 + $0x160] sm:$0xff] }
 0x138   : > { %1391 = vst.msk [vmem:[#allocation3 + $0x148] sm:$0xff] %vm847_vm4, %v1343_v47  ;;  %2732 = vmatmul.msk.f32.gmra.mxu2 %vm437_vm2, %v3447_v18  ;;  %v1915_v23 = vld [vmem:[#allocation3 + $0x70] sm:$0xff]  ;;  %2634 = vmatmul.msk.f32.gmra.mxu0 %vm437_vm2, %v3363_v6 }
 0x139   : > { %1868 = vst.msk [vmem:[#allocation3 + $0x78] sm:$0xff] %vm847_vm4, %v1820_v22  ;;  %v2230_v24 = vrot.slane %v1915_v23, 2  ;;  %v2021_v25 = vrot.slane %v1915_v23, 1  ;;  %2746 = vmatmul.msk.f32.gmra.mxu3 %vm437_vm2, %v1445_v1 }
 0x13b   : > { %v2231_v27 = vsel %vm2206_vm5, %v2228_v3, %v2230_v24  ;;  %v2022_v43 = vsel %vm1997_vm6, %v2019_v5, %v2021_v25  ;;  %v1661_v30 = vpop.f32.mrf.mxu2 }
 0x13c   : > { %v1161_v33 = vpop.f32.mrf.mxu1  ;;  %2305 = vrot.lane.b32.xlu2 %v2231_v27, %s2811_s6  ;;  %2096 = vrot.lane.b32.xlu0 %v2022_v43, %s2812_s7  ;;  %v1236_v49 = vpop.f32.mrf.mxu3 }
 0x13d   : > { %v1319_v6 = vadd.f32 %v1271_v12, %v1161_v33  ;;  %v1344_v35 = vadd.f32 %v1296_v34, %v1236_v49  ;;  %v760_v37 = vpop.f32.mrf.mxu0  ;;  %v1272_v40 = vld [vmem:[#allocation3 + $0x90] sm:$0xff] }
 0x13e   : > { %v1773_v39 = vld [vmem:[#allocation3 + $0x80] sm:$0xff]  ;;  %867 = vst.msk [vmem:[#allocation3 + $0x98] sm:$0xff] %vm847_vm4, %v760_v37 }
 0x13f   : > { %1367 = vst.msk [vmem:[#allocation3 + $0x88] sm:$0xff] %vm847_vm4, %v1319_v6  ;;  %v1821_v13 = vadd.f32 %v1773_v39, %v1661_v30  ;;  %2683 = vmatmul.msk.f32.gmra.mxu1 %vm437_vm2, %v3408_v50  ;;  %v1433_v50 = vld [vmem:[#allocation2 + $0x140] sm:$0xff]  ;;  %v1299_v30 = vld [vmem:[#allocation3 + $0x168] sm:$0xff] }
 0x140   : > { %1392 = vst.msk [vmem:[#allocation3 + $0x150] sm:$0xff] %vm847_vm4, %v1344_v35  ;;  %2733 = vmatmul.msk.f32.gmra.mxu2 %vm437_vm2, %v1432_v36  ;;  %2635 = vmatmul.msk.f32.gmra.mxu0 %vm437_vm2, %v3390_v21  ;;  %v3474_v54 = vld [vmem:[#allocation3 + $0x78] sm:$0xff] }
 0x141   : > { %1869 = vst.msk [vmem:[#allocation3 + $0x80] sm:$0xff] %vm847_vm4, %v1821_v13  ;;  %2747 = vmatmul.msk.f32.gmra.mxu3 %vm437_vm2, %v1446_v29  ;;  %v2232_v32 = vrot.slane %v3474_v54, 2  ;;  %v2023_v0 = vrot.slane %v3474_v54, 1 }
 0x143   : > { %v1664_v48 = vpop.f32.mrf.mxu2 }
 0x144   : > { %v1164_v41 = vpop.f32.mrf.mxu1  ;;  %v1239_v51 = vpop.f32.mrf.mxu3 }
 0x145   : > { %v1320_v26 = vadd.f32 %v1272_v40, %v1164_v41  ;;  %v1345_v53 = vadd.f32 %v1297_v2, %v1239_v51  ;;  %v763_v56 = vpop.f32.mrf.mxu0  ;;  %v1273_v3 = vld [vmem:[#allocation3 + $0x98] sm:$0xff] }
 0x146   : > { %v1774_v52 = vld [vmem:[#allocation3 + $0x88] sm:$0xff]  ;;  %v2079_v58 = vpop.permute.xlu0 %2078  ;;  %868 = vst.msk [vmem:[#allocation3 + $0xa0] sm:$0xff] %vm847_vm4, %v763_v56 }
 0x147   : > { %1368 = vst.msk [vmem:[#allocation3 + $0x90] sm:$0xff] %vm847_vm4, %v1320_v26  ;;  %v1822_v21 = vadd.f32 %v1774_v52, %v1664_v48  ;;  %v2174_v59 = vadd.f32 %v2079_v58, %v3169_v42  ;;  %2684 = vmatmul.msk.f32.gmra.mxu1 %vm437_vm2, %v3422_v60  ;;  %v1300_v48 = vld [vmem:[#allocation3 + $0x170] sm:$0xff] }
 0x148   : > { %1393 = vst.msk [vmem:[#allocation3 + $0x158] sm:$0xff] %vm847_vm4, %v1345_v53  ;;  %2734 = vmatmul.msk.f32.gmra.mxu2 %vm437_vm2, %v1433_v50  ;;  %v3489_v62 = vld [vmem:[#allocation3 + $0x80] sm:$0xff] }
 0x149   : > { %1870 = vst.msk [vmem:[#allocation3 + $0x88] sm:$0xff] %vm847_vm4, %v1822_v21  ;;  %v2383_v42 = vadd.f32 %v2288_v61, %v2174_v59  ;;  %v2233_v60 = vrot.slane %v3489_v62, 2  ;;  %v2024_v44 = vrot.slane %v3489_v62, 1 }
 0x14b   : > { %2416 = vst.msk [vmem:[%s3485_s14] sm:$0xff] %vm2415_vm7, %v2383_v42  ;;  %v2234_v4 = vsel %vm2206_vm5, %v2232_v32, %v2233_v60  ;;  %v2025_v5 = vsel %vm1997_vm6, %v2023_v0, %v2024_v44  ;;  %v1667_v7 = vpop.f32.mrf.mxu2 }
 0x14c   : > { %v1167_v45 = vpop.f32.mrf.mxu1  ;;  %2307 = vrot.lane.b32.xlu0 %v2234_v4, %s2811_s6  ;;  %2098 = vrot.lane.b32.xlu1 %v2025_v5, %s2812_s7  ;;  %v1242_v55 = vpop.f32.mrf.mxu3  ;;  %v1301_v4 = vld [vmem:[#allocation3 + $0x178] sm:$0xff] }
 0x14d   : > { %v1321_v11 = vadd.f32 %v1273_v3, %v1167_v45  ;;  %v1346_v57 = vadd.f32 %v1298_v10, %v1242_v55  ;;  %v766_v63 = vpop.f32.mrf.mxu0  ;;  %v1274_v24 = vld [vmem:[#allocation3 + $0xa0] sm:$0xff] }
 0x14e   : > { %v1775_v47 = vld [vmem:[#allocation3 + $0x90] sm:$0xff]  ;;  %v2081_v19 = vpop.permute.xlu0 %2080  ;;  %869 = vst.msk [vmem:[#allocation3 + $0xa8] sm:$0xff] %vm847_vm4, %v766_v63  ;;  %v2294_v63 = vpop.permute.xlu2 %2293 }
 0x14f   : > { %1369 = vst.msk [vmem:[#allocation3 + $0x98] sm:$0xff] %vm847_vm4, %v1321_v11  ;;  %v1823_v20 = vadd.f32 %v1775_v47, %v1667_v7  ;;  %2685 = vmatmul.msk.f32.gmra.mxu1 %vm437_vm2, %v3447_v18  ;;  %v2175_v33 = vadd.f32 %v2081_v19, %v3179_v46 }
 0x150   : > { %1394 = vst.msk [vmem:[#allocation3 + $0x160] sm:$0xff] %vm847_vm4, %v1346_v57  ;;  %2735 = vmatmul.msk.f32.gmra.mxu2 %vm437_vm2, %v1434_v14  ;;  %v1918_v1 = vld [vmem:[#allocation3 + $0x88] sm:$0xff] }
 0x151   : > { %1871 = vst.msk [vmem:[#allocation3 + $0x90] sm:$0xff] %vm847_vm4, %v1823_v20  ;;  %v2235_v22 = vrot.slane %v1918_v1, 2  ;;  %v2026_v23 = vrot.slane %v1918_v1, 1 }
 0x153   : > { %v2236_v25 = vsel %vm2206_vm5, %v2233_v60, %v2235_v22  ;;  %v2027_v12 = vsel %vm1997_vm6, %v2024_v44, %v2026_v23  ;;  %v1670_v27 = vpop.f32.mrf.mxu2 }
 0x154   : > { %v1170_v43 = vpop.f32.mrf.mxu1  ;;  %2309 = vrot.lane.b32.xlu1 %v2236_v25, %s2811_s6  ;;  %2100 = vrot.lane.b32.xlu2 %v2027_v12, %s2812_s7  ;;  %v1245_v18 = vpop.f32.mrf.mxu3  ;;  %v1793_v12 = vld [vmem:[#allocation3 + $0x120] sm:$0xff] }
 0x155   : > { %v1322_v49 = vadd.f32 %v1274_v24, %v1170_v43  ;;  %v1347_v34 = vadd.f32 %v1299_v30, %v1245_v18  ;;  %v769_v6 = vpop.f32.mrf.mxu0  ;;  %v1275_v29 = vld [vmem:[#allocation3 + $0xa8] sm:$0xff] }
 0x156   : > { %v1776_v35 = vld [vmem:[#allocation3 + $0x98] sm:$0xff]  ;;  %v2290_v36 = vpop.permute.xlu0 %2289  ;;  %870 = vst.msk [vmem:[#allocation3 + $0xb0] sm:$0xff] %vm847_vm4, %v769_v6 }
 0x157   : > { %1370 = vst.msk [vmem:[#allocation3 + $0xa0] sm:$0xff] %vm847_vm4, %v1322_v49  ;;  %v1824_v37 = vadd.f32 %v1776_v35, %v1670_v27  ;;  %v2384_v39 = vadd.f32 %v2290_v36, %v2175_v33 }
 0x158   : > { %1395 = vst.msk [vmem:[#allocation3 + $0x168] sm:$0xff] %vm847_vm4, %v1347_v34  ;;  %v3520_v50 = vld [vmem:[#allocation3 + $0x90] sm:$0xff] }
 0x159   : > { %1872 = vst.msk [vmem:[#allocation3 + $0x98] sm:$0xff] %vm847_vm4, %v1824_v37  ;;  %v2237_v58 = vrot.slane %v3520_v50, 2  ;;  %v2028_v59 = vrot.slane %v3520_v50, 1 }
 0x15a   : > { %2417 = vst.msk [vmem:[%s3485_s14 + $0x8] sm:$0xff] %vm2415_vm7, %v2384_v39 }
 0x15b   : > { %v1673_v13 = vpop.f32.mrf.mxu2 }
 0x15c   : > { %v1173_v46 = vpop.f32.mrf.mxu1  ;;  %v1248_v40 = vpop.f32.mrf.mxu3 }
 0x15d   : > { %v1323_v41 = vadd.f32 %v1275_v29, %v1173_v46  ;;  %v1348_v51 = vadd.f32 %v1300_v48, %v1248_v40  ;;  %v772_v2 = vpop.f32.mrf.mxu0  ;;  %v1276_v32 = vld [vmem:[#allocation3 + $0xb0] sm:$0xff] }
 0x15e   : > { %v1777_v26 = vld [vmem:[#allocation3 + $0xa0] sm:$0xff]  ;;  %v2083_v53 = vpop.permute.xlu1 %2082  ;;  %871 = vst.msk [vmem:[#allocation3 + $0xb8] sm:$0xff] %vm847_vm4, %v772_v2  ;;  %v2087_v6 = vpop.permute.xlu2 %2086 }
 0x15f   : > { %1371 = vst.msk [vmem:[#allocation3 + $0xa8] sm:$0xff] %vm847_vm4, %v1323_v41  ;;  %v1825_v56 = vadd.f32 %v1777_v26, %v1673_v13  ;;  %v2176_v5 = vadd.f32 %v2083_v53, %v3237_v28  ;;  %v1794_v13 = vld [vmem:[#allocation3 + $0x128] sm:$0xff]  ;;  %v2178_v46 = vadd.f32 %v2087_v6, %v3299_v15 }
 0x160   : > { %1396 = vst.msk [vmem:[#allocation3 + $0x170] sm:$0xff] %vm847_vm4, %v1348_v51  ;;  %v3525_v52 = vld [vmem:[#allocation3 + $0x98] sm:$0xff] }
 0x161   : > { %1873 = vst.msk [vmem:[#allocation3 + $0xa0] sm:$0xff] %vm847_vm4, %v1825_v56  ;;  %v2238_v21 = vrot.slane %v3525_v52, 2  ;;  %v2029_v61 = vrot.slane %v3525_v52, 1 }
 0x163   : > { %v2239_v42 = vsel %vm2206_vm5, %v2237_v58, %v2238_v21  ;;  %v2030_v60 = vsel %vm1997_vm6, %v2028_v59, %v2029_v61  ;;  %v1676_v0 = vpop.f32.mrf.mxu2 }
 0x164   : > { %v1176_v44 = vpop.f32.mrf.mxu1  ;;  %2311 = vrot.lane.b32.xlu2 %v2239_v42, %s2811_s6  ;;  %2102 = vrot.lane.b32.xlu0 %v2030_v60, %s2812_s7  ;;  %v1251_v3 = vpop.f32.mrf.mxu3 }
 0x165   : > { %v1324_v7 = vadd.f32 %v1276_v32, %v1176_v44  ;;  %v1349_v45 = vadd.f32 %v1301_v4, %v1251_v3  ;;  %v775_v55 = vpop.f32.mrf.mxu0  ;;  %v1277_v20 = vld [vmem:[#allocation3 + $0xb8] sm:$0xff]  ;;  %v1795_v4 = vld [vmem:[#allocation3 + $0x130] sm:$0xff] }
 0x166   : > { %v1778_v10 = vld [vmem:[#allocation3 + $0xa8] sm:$0xff]  ;;  %v2292_v11 = vpop.permute.xlu1 %2291  ;;  %872 = vst.msk [vmem:[#allocation3 + $0xc0] sm:$0xff] %vm847_vm4, %v775_v55 }
 0x167   : > { %1372 = vst.msk [vmem:[#allocation3 + $0xb0] sm:$0xff] %vm847_vm4, %v1324_v7  ;;  %v1826_v57 = vadd.f32 %v1778_v10, %v1676_v0  ;;  %v2385_v14 = vadd.f32 %v2292_v11, %v2176_v5 }
 0x168   : > { %1397 = vst.msk [vmem:[#allocation3 + $0x178] sm:$0xff] %vm847_vm4, %v1349_v45  ;;  %v1921_v47 = vld [vmem:[#allocation3 + $0xa0] sm:$0xff] }
 0x169   : > { %1874 = vst.msk [vmem:[#allocation3 + $0xa8] sm:$0xff] %vm847_vm4, %v1826_v57  ;;  %v2240_v19 = vrot.slane %v1921_v47, 2  ;;  %v2031_v28 = vrot.slane %v1921_v47, 1 }
 0x16a   : > { %2418 = vst.msk [vmem:[%s3485_s14 + $0x10] sm:$0xff] %vm2415_vm7, %v2385_v14 }
 0x16b   : > { %v2241_v1 = vsel %vm2206_vm5, %v2238_v21, %v2240_v19  ;;  %v2032_v22 = vsel %vm1997_vm6, %v2029_v61, %v2031_v28  ;;  %v1679_v23 = vpop.f32.mrf.mxu2  ;;  %v2089_v61 = vpop.permute.xlu2 %2088 }
 0x16c   : > { %v1179_v24 = vpop.f32.mrf.mxu1  ;;  %2313 = vrot.lane.b32.xlu0 %v2241_v1, %s2811_s6  ;;  %2104 = vrot.lane.b32.xlu1 %v2032_v22, %s2812_s7  ;;  %v1721_v25 = vpop.f32.mrf.mxu3  ;;  %v2179_v5 = vadd.f32 %v2089_v61, %v3307_v17 }
 0x16d   : > { %v1325_v27 = vadd.f32 %v1277_v20, %v1179_v24  ;;  %v1841_v43 = vadd.f32 %v1793_v12, %v1721_v25  ;;  %v778_v18 = vpop.f32.mrf.mxu0  ;;  %v1278_v36 = vld [vmem:[#allocation3 + $0xc0] sm:$0xff]  ;;  %v1796_v24 = vld [vmem:[#allocation3 + $0x138] sm:$0xff] }
 0x16e   : > { %v1779_v30 = vld [vmem:[#allocation3 + $0xb0] sm:$0xff]  ;;  %v2085_v33 = vpop.permute.xlu1 %2084  ;;  %873 = vst.msk [vmem:[#allocation3 + $0xc8] sm:$0xff] %vm847_vm4, %v778_v18 }
 0x16f   : > { %1373 = vst.msk [vmem:[#allocation3 + $0xb8] sm:$0xff] %vm847_vm4, %v1325_v27  ;;  %v1827_v49 = vadd.f32 %v1779_v30, %v1679_v23  ;;  %v2177_v34 = vadd.f32 %v2085_v33, %v3245_v31 }
 0x170   : > { %1889 = vst.msk [vmem:[#allocation3 + $0x120] sm:$0xff] %vm847_vm4, %v1841_v43  ;;  %v3555_v2 = vld [vmem:[#allocation3 + $0xa8] sm:$0xff] }
 0x171   : > { %1875 = vst.msk [vmem:[#allocation3 + $0xb0] sm:$0xff] %vm847_vm4, %v1827_v49  ;;  %v2386_v35 = vadd.f32 %v2294_v63, %v2177_v34  ;;  %v2242_v15 = vrot.slane %v3555_v2, 2  ;;  %v2033_v21 = vrot.slane %v3555_v2, 1 }
 0x173   : > { %2419 = vst.msk [vmem:[%s3485_s14 + $0x18] sm:$0xff] %vm2415_vm7, %v2386_v35  ;;  %v1682_v37 = vpop.f32.mrf.mxu2 }
 0x174   : > { %v1182_v39 = vpop.f32.mrf.mxu1  ;;  %v1724_v29 = vpop.f32.mrf.mxu3 }
 0x175   : > { %v1326_v40 = vadd.f32 %v1278_v36, %v1182_v39  ;;  %v1842_v48 = vadd.f32 %v1794_v13, %v1724_v29  ;;  %v781_v41 = vpop.f32.mrf.mxu0  ;;  %v1279_v32 = vld [vmem:[#allocation3 + $0xc8] sm:$0xff] }
 0x176   : > { %v1780_v31 = vld [vmem:[#allocation3 + $0xb8] sm:$0xff]  ;;  %v2296_v51 = vpop.permute.xlu0 %2295  ;;  %874 = vst.msk [vmem:[#allocation3 + $0xd0] sm:$0xff] %vm847_vm4, %v781_v41 }
 0x177   : > { %1374 = vst.msk [vmem:[#allocation3 + $0xc0] sm:$0xff] %vm847_vm4, %v1326_v40  ;;  %v1828_v26 = vadd.f32 %v1780_v31, %v1682_v37  ;;  %v2387_v53 = vadd.f32 %v2296_v51, %v2178_v46  ;;  %v3586_v30 = vld [vmem:[#allocation3 + $0x120] sm:$0xff] }
 0x178   : > { %1890 = vst.msk [vmem:[#allocation3 + $0x128] sm:$0xff] %vm847_vm4, %v1842_v48  ;;  %v3560_v56 = vld [vmem:[#allocation3 + $0xb0] sm:$0xff]  ;;  %v2267_v36 = vrot.slane %v3586_v30, 2  ;;  %v2058_v37 = vrot.slane %v3586_v30, 1  ;;  %v1797_v31 = vld [vmem:[#allocation3 + $0x140] sm:$0xff] }
 0x179   : > { %1876 = vst.msk [vmem:[#allocation3 + $0xb8] sm:$0xff] %vm847_vm4, %v1828_v26  ;;  %v2243_v58 = vrot.slane %v3560_v56, 2  ;;  %v2034_v59 = vrot.slane %v3560_v56, 1 }
 0x17a   : > { %2420 = vst.msk [vmem:[%s3485_s14 + $0x20] sm:$0xff] %vm2415_vm7, %v2387_v53 }
 0x17b   : > { %v2244_v42 = vsel %vm2206_vm5, %v2242_v15, %v2243_v58  ;;  %v2035_v60 = vsel %vm1997_vm6, %v2033_v21, %v2034_v59  ;;  %v1685_v0 = vpop.f32.mrf.mxu2 }
 0x17c   : > { %v1185_v44 = vpop.f32.mrf.mxu1  ;;  %2315 = vrot.lane.b32.xlu1 %v2244_v42, %s2811_s6  ;;  %2106 = vrot.lane.b32.xlu2 %v2035_v60, %s2812_s7  ;;  %v1727_v3 = vpop.f32.mrf.mxu3 }
 0x17d   : > { %v1327_v7 = vadd.f32 %v1279_v32, %v1185_v44  ;;  %v1843_v45 = vadd.f32 %v1795_v4, %v1727_v3  ;;  %v784_v55 = vpop.f32.mrf.mxu0  ;;  %v1280_v17 = vld [vmem:[#allocation3 + $0xd0] sm:$0xff]  ;;  %v2300_v42 = vpop.permute.xlu2 %2299 }
 0x17e   : > { %v1781_v10 = vld [vmem:[#allocation3 + $0xc0] sm:$0xff]  ;;  %v2298_v11 = vpop.permute.xlu1 %2297  ;;  %875 = vst.msk [vmem:[#allocation3 + $0xd8] sm:$0xff] %vm847_vm4, %v784_v55 }
 0x17f   : > { %1375 = vst.msk [vmem:[#allocation3 + $0xc8] sm:$0xff] %vm847_vm4, %v1327_v7  ;;  %v1829_v57 = vadd.f32 %v1781_v10, %v1685_v0  ;;  %v2388_v14 = vadd.f32 %v2298_v11, %v2179_v5  ;;  %v3584_v25 = vld [vmem:[#allocation3 + $0x128] sm:$0xff] }
 0x180   : > { %1891 = vst.msk [vmem:[#allocation3 + $0x130] sm:$0xff] %vm847_vm4, %v1843_v45  ;;  %v1924_v63 = vld [vmem:[#allocation3 + $0xb8] sm:$0xff]  ;;  %v2268_v49 = vrot.slane %v3584_v25, 2  ;;  %v2059_v34 = vrot.slane %v3584_v25, 1  ;;  %v1798_v10 = vld [vmem:[#allocation3 + $0x148] sm:$0xff] }
 0x181   : > { %1877 = vst.msk [vmem:[#allocation3 + $0xc0] sm:$0xff] %vm847_vm4, %v1829_v57  ;;  %v2245_v47 = vrot.slane %v1924_v63, 2  ;;  %v2036_v19 = vrot.slane %v1924_v63, 1 }
 0x182   : > { %2421 = vst.msk [vmem:[%s3485_s14 + $0x28] sm:$0xff] %vm2415_vm7, %v2388_v14  ;;  %v2269_v13 = vsel %vm2206_vm5, %v2267_v36, %v2268_v49  ;;  %v2060_v46 = vsel %vm1997_vm6, %v2058_v37, %v2059_v34 }
 0x183   : > { %v2246_v28 = vsel %vm2206_vm5, %v2243_v58, %v2245_v47  ;;  %v2037_v20 = vsel %vm1997_vm6, %v2034_v59, %v2036_v19  ;;  %v1688_v1 = vpop.f32.mrf.mxu2 }
 0x184   : > { %v1188_v22 = vpop.f32.mrf.mxu1  ;;  %2317 = vrot.lane.b32.xlu2 %v2246_v28, %s2811_s6  ;;  %2108 = vrot.lane.b32.xlu0 %v2037_v20, %s2812_s7  ;;  %v1730_v23 = vpop.f32.mrf.mxu3 }
 0x185   : > { %v1328_v12 = vadd.f32 %v1280_v17, %v1188_v22  ;;  %v1844_v27 = vadd.f32 %v1796_v24, %v1730_v23  ;;  %v787_v43 = vpop.f32.mrf.mxu0  ;;  %v1281_v39 = vld [vmem:[#allocation3 + $0xd8] sm:$0xff] }
 0x186   : > { %v1782_v18 = vld [vmem:[#allocation3 + $0xc8] sm:$0xff]  ;;  %876 = vst.msk [vmem:[#allocation3 + $0xe0] sm:$0xff] %vm847_vm4, %v787_v43 }
 0x187   : > { %1376 = vst.msk [vmem:[#allocation3 + $0xd0] sm:$0xff] %vm847_vm4, %v1328_v12  ;;  %v1830_v33 = vadd.f32 %v1782_v18, %v1688_v1  ;;  %v1939_v6 = vld [vmem:[#allocation3 + $0x130] sm:$0xff] }
 0x188   : > { %1892 = vst.msk [vmem:[#allocation3 + $0x138] sm:$0xff] %vm847_vm4, %v1844_v27  ;;  %v2061_v35 = vrot.slane %v1939_v6, 1  ;;  %v3603_v21 = vld [vmem:[#allocation3 + $0xc0] sm:$0xff]  ;;  %v2270_v32 = vrot.slane %v1939_v6, 2  ;;  %v1799_v6 = vld [vmem:[#allocation3 + $0x150] sm:$0xff] }
 0x189   : > { %1878 = vst.msk [vmem:[#allocation3 + $0xc8] sm:$0xff] %vm847_vm4, %v1830_v33  ;;  %v2038_v44 = vrot.slane %v3603_v21, 1  ;;  %v2247_v23 = vrot.slane %v3603_v21, 2 }
 0x18a   : > { %v2062_v29 = vsel %vm1997_vm6, %v2059_v34, %v2061_v35  ;;  %v2271_v5 = vsel %vm2206_vm5, %v2268_v49, %v2270_v32 }
 0x18b   : > { %v1691_v40 = vpop.f32.mrf.mxu2  ;;  %2128 = vrot.lane.b32.xlu1 %v2062_v29, %s2812_s7 }
 0x18c   : > { %v1191_v48 = vpop.f32.mrf.mxu1  ;;  %2335 = vrot.lane.b32.xlu2 %v2269_v13, %s2811_s6  ;;  %2126 = vrot.lane.b32.xlu0 %v2060_v46, %s2812_s7  ;;  %v1733_v41 = vpop.f32.mrf.mxu3 }
 0x18d   : > { %v1329_v51 = vadd.f32 %v1281_v39, %v1191_v48  ;;  %v1845_v26 = vadd.f32 %v1797_v31, %v1733_v41  ;;  %v790_v53 = vpop.f32.mrf.mxu0  ;;  %v1282_v4 = vld [vmem:[#allocation3 + $0xe0] sm:$0xff] }
 0x18e   : > { %v1783_v15 = vld [vmem:[#allocation3 + $0xd0] sm:$0xff]  ;;  %v2091_v58 = vpop.permute.xlu0 %2090  ;;  %877 = vst.msk [vmem:[#allocation3 + $0xe8] sm:$0xff] %vm847_vm4, %v790_v53 }
 0x18f   : > { %1377 = vst.msk [vmem:[#allocation3 + $0xd8] sm:$0xff] %vm847_vm4, %v1329_v51  ;;  %v1831_v59 = vadd.f32 %v1783_v15, %v1691_v40  ;;  %v2180_v61 = vadd.f32 %v2091_v58, %v3366_v8  ;;  %v3636_v13 = vld [vmem:[#allocation3 + $0x138] sm:$0xff] }
 0x190   : > { %1893 = vst.msk [vmem:[#allocation3 + $0x140] sm:$0xff] %vm847_vm4, %v1845_v26  ;;  %v3608_v60 = vld [vmem:[#allocation3 + $0xc8] sm:$0xff]  ;;  %v2063_v51 = vrot.slane %v3636_v13, 1  ;;  %v2095_v26 = vpop.permute.xlu2 %2094  ;;  %v2272_v58 = vrot.slane %v3636_v13, 2 }
 0x191   : > { %1879 = vst.msk [vmem:[#allocation3 + $0xd0] sm:$0xff] %vm847_vm4, %v1831_v59  ;;  %v2389_v0 = vadd.f32 %v2300_v42, %v2180_v61  ;;  %v2039_v3 = vrot.slane %v3608_v60, 1  ;;  %v2248_v28 = vrot.slane %v3608_v60, 2 }
 0x193   : > { %2422 = vst.msk [vmem:[%s3485_s14 + $0x30] sm:$0xff] %vm2415_vm7, %v2389_v0  ;;  %v1694_v7 = vpop.f32.mrf.mxu2  ;;  %v2040_v8 = vsel %vm1997_vm6, %v2038_v44, %v2039_v3  ;;  %v2249_v43 = vsel %vm2206_vm5, %v2247_v23, %v2248_v28  ;;  %v1800_v44 = vld [vmem:[#allocation3 + $0x158] sm:$0xff] }
 0x194   : > { %v1194_v45 = vpop.f32.mrf.mxu1  ;;  %2337 = vrot.lane.b32.xlu0 %v2271_v5, %s2811_s6  ;;  %2110 = vrot.lane.b32.xlu1 %v2040_v8, %s2812_s7  ;;  %v1736_v55 = vpop.f32.mrf.mxu3 }
 0x195   : > { %v1330_v11 = vadd.f32 %v1282_v4, %v1194_v45  ;;  %v1846_v57 = vadd.f32 %v1798_v10, %v1736_v55  ;;  %v793_v14 = vpop.f32.mrf.mxu0  ;;  %v1283_v27 = vld [vmem:[#allocation3 + $0xe8] sm:$0xff] }
 0x196   : > { %v1784_v63 = vld [vmem:[#allocation3 + $0xd8] sm:$0xff]  ;;  %v2093_v47 = vpop.permute.xlu1 %2092  ;;  %878 = vst.msk [vmem:[#allocation3 + $0xf0] sm:$0xff] %vm847_vm4, %v793_v14  ;;  %v2302_v20 = vpop.permute.xlu0 %2301 }
 0x197   : > { %1378 = vst.msk [vmem:[#allocation3 + $0xe0] sm:$0xff] %vm847_vm4, %v1330_v11  ;;  %v1832_v19 = vadd.f32 %v1784_v63, %v1694_v7  ;;  %v2181_v17 = vadd.f32 %v2093_v47, %v3375_v9  ;;  %v3633_v35 = vld [vmem:[#allocation3 + $0x140] sm:$0xff] }
 0x198   : > { %1894 = vst.msk [vmem:[#allocation3 + $0x148] sm:$0xff] %vm847_vm4, %v1846_v57  ;;  %v1927_v1 = vld [vmem:[#allocation3 + $0xd0] sm:$0xff]  ;;  %v2064_v40 = vrot.slane %v3633_v35, 1  ;;  %v2273_v31 = vrot.slane %v3633_v35, 2 }
 0x199   : > { %1880 = vst.msk [vmem:[#allocation3 + $0xd8] sm:$0xff] %vm847_vm4, %v1832_v19  ;;  %v2390_v22 = vadd.f32 %v2302_v20, %v2181_v17  ;;  %v2041_v24 = vrot.slane %v1927_v1, 1  ;;  %v2250_v12 = vrot.slane %v1927_v1, 2 }
 0x19a   : > { %v2065_v59 = vsel %vm1997_vm6, %v2063_v51, %v2064_v40  ;;  %v2274_v42 = vsel %vm2206_vm5, %v2272_v58, %v2273_v31  ;;  %v1802_v51 = vld [vmem:[#allocation3 + $0x168] sm:$0xff] }
 0x19b   : > { %2423 = vst.msk [vmem:[%s3485_s14 + $0x38] sm:$0xff] %vm2415_vm7, %v2390_v22  ;;  %v2042_v9 = vsel %vm1997_vm6, %v2039_v3, %v2041_v24  ;;  %v1697_v18 = vpop.f32.mrf.mxu2  ;;  %v2251_v49 = vsel %vm2206_vm5, %v2248_v28, %v2250_v12  ;;  %v2182_v3 = vadd.f32 %v2095_v26, %v3424_v38  ;;  %v1801_v22 = vld [vmem:[#allocation3 + $0x160] sm:$0xff] }
 0x19c   : > { %v1197_v33 = vpop.f32.mrf.mxu1  ;;  %2319 = vrot.lane.b32.xlu0 %v2249_v43, %s2811_s6  ;;  %2112 = vrot.lane.b32.xlu2 %v2042_v9, %s2812_s7  ;;  %v1739_v34 = vpop.f32.mrf.mxu3 }
 0x19d   : > { %v1331_v36 = vadd.f32 %v1283_v27, %v1197_v33  ;;  %2321 = vrot.lane.b32.xlu1 %v2251_v49, %s2811_s6  ;;  %v1847_v37 = vadd.f32 %v1799_v6, %v1739_v34  ;;  %v796_v39 = vpop.f32.mrf.mxu0  ;;  %v1284_v53 = vld [vmem:[#allocation3 + $0xf0] sm:$0xff]  ;;  %v2306_v49 = vpop.permute.xlu2 %2305 }
 0x19e   : > { %v1785_v29 = vld [vmem:[#allocation3 + $0xe0] sm:$0xff]  ;;  %879 = vst.msk [vmem:[#allocation3 + $0xf8] sm:$0xff] %vm847_vm4, %v796_v39 }
 0x19f   : > { %1379 = vst.msk [vmem:[#allocation3 + $0xe8] sm:$0xff] %vm847_vm4, %v1331_v36  ;;  %v1833_v46 = vadd.f32 %v1785_v29, %v1697_v18  ;;  %v1942_v48 = vld [vmem:[#allocation3 + $0x148] sm:$0xff] }
 0x1a0   : > { %1895 = vst.msk [vmem:[#allocation3 + $0x150] sm:$0xff] %vm847_vm4, %v1847_v37  ;;  %v2066_v41 = vrot.slane %v1942_v48, 1  ;;  %v3654_v55 = vld [vmem:[#allocation3 + $0xd8] sm:$0xff]  ;;  %v2275_v57 = vrot.slane %v1942_v48, 2 }
 0x1a1   : > { %1881 = vst.msk [vmem:[#allocation3 + $0xe0] sm:$0xff] %vm847_vm4, %v1833_v46  ;;  %v2043_v14 = vrot.slane %v3654_v55, 1  ;;  %v2252_v36 = vrot.slane %v3654_v55, 2 }
 0x1a2   : > { %v2067_v15 = vsel %vm1997_vm6, %v2064_v40, %v2066_v41  ;;  %v2276_v19 = vsel %vm2206_vm5, %v2273_v31, %v2275_v57 }
 0x1a3   : > { %v1700_v61 = vpop.f32.mrf.mxu2 }
 0x1a4   : > { %v1200_v32 = vpop.f32.mrf.mxu1  ;;  %2130 = vrot.lane.b32.xlu2 %v2065_v59, %s2812_s7  ;;  %2132 = vrot.lane.b32.xlu0 %v2067_v15, %s2812_s7  ;;  %v1742_v0 = vpop.f32.mrf.mxu3 }
 0x1a5   : > { %v1332_v4 = vadd.f32 %v1284_v53, %v1200_v32  ;;  %2339 = vrot.lane.b32.xlu1 %v2274_v42, %s2811_s6  ;;  %v1848_v5 = vadd.f32 %v1800_v44, %v1742_v0  ;;  %v799_v7 = vpop.f32.mrf.mxu0  ;;  %v1285_v47 = vld [vmem:[#allocation3 + $0xf8] sm:$0xff] }
 0x1a6   : > { %v1786_v8 = vld [vmem:[#allocation3 + $0xe8] sm:$0xff]  ;;  %v2304_v45 = vpop.permute.xlu1 %2303  ;;  %880 = vst.msk [vmem:[#allocation3 + $0x100] sm:$0xff] %vm847_vm4, %v799_v7 }
 0x1a7   : > { %1380 = vst.msk [vmem:[#allocation3 + $0xf0] sm:$0xff] %vm847_vm4, %v1332_v4  ;;  %v1834_v10 = vadd.f32 %v1786_v8, %v1700_v61  ;;  %v2391_v11 = vadd.f32 %v2304_v45, %v2182_v3  ;;  %v3686_v61 = vld [vmem:[#allocation3 + $0x150] sm:$0xff] }
 0x1a8   : > { %1896 = vst.msk [vmem:[#allocation3 + $0x158] sm:$0xff] %vm847_vm4, %v1848_v5  ;;  %v3658_v38 = vld [vmem:[#allocation3 + $0xe0] sm:$0xff]  ;;  %v2068_v4 = vrot.slane %v3686_v61, 1  ;;  %v2277_v8 = vrot.slane %v3686_v61, 2 }
 0x1a9   : > { %1882 = vst.msk [vmem:[#allocation3 + $0xe8] sm:$0xff] %vm847_vm4, %v1834_v10  ;;  %v2044_v63 = vrot.slane %v3658_v38, 1  ;;  %v2253_v33 = vrot.slane %v3658_v38, 2 }
 0x1aa   : > { %2424 = vst.msk [vmem:[%s3485_s14 + $0x40] sm:$0xff] %vm2415_vm7, %v2391_v11 }
 0x1ab   : > { %v1703_v17 = vpop.f32.mrf.mxu2  ;;  %v2045_v28 = vsel %vm1997_vm6, %v2043_v14, %v2044_v63  ;;  %v2254_v46 = vsel %vm2206_vm5, %v2252_v36, %v2253_v33 }
 0x1ac   : > { %v1203_v20 = vpop.f32.mrf.mxu1  ;;  %2341 = vrot.lane.b32.xlu2 %v2276_v19, %s2811_s6  ;;  %2114 = vrot.lane.b32.xlu0 %v2045_v28, %s2812_s7  ;;  %v1745_v1 = vpop.f32.mrf.mxu3 }
 0x1ad   : > { %v1333_v23 = vadd.f32 %v1285_v47, %v1203_v20  ;;  %v1849_v24 = vadd.f32 %v1801_v22, %v1745_v1  ;;  %v802_v12 = vpop.f32.mrf.mxu0  ;;  %v1286_v29 = vld [vmem:[#allocation3 + $0x100] sm:$0xff] }
 0x1ae   : > { %v1787_v27 = vld [vmem:[#allocation3 + $0xf0] sm:$0xff]  ;;  %v2097_v43 = vpop.permute.xlu0 %2096  ;;  %881 = vst.msk [vmem:[#allocation3 + $0x108] sm:$0xff] %vm847_vm4, %v802_v12 }
 0x1af   : > { %1381 = vst.msk [vmem:[#allocation3 + $0xf8] sm:$0xff] %vm847_vm4, %v1333_v23  ;;  %v1835_v9 = vadd.f32 %v1787_v27, %v1703_v17  ;;  %v2183_v18 = vadd.f32 %v2097_v43, %v3433_v16  ;;  %v3683_v26 = vld [vmem:[#allocation3 + $0x158] sm:$0xff] }
 0x1b0   : > { %1897 = vst.msk [vmem:[#allocation3 + $0x160] sm:$0xff] %vm847_vm4, %v1849_v24  ;;  %v1930_v34 = vld [vmem:[#allocation3 + $0xe8] sm:$0xff]  ;;  %v2069_v42 = vrot.slane %v3683_v26, 1  ;;  %v2278_v3 = vrot.slane %v3683_v26, 2 }
 0x1b1   : > { %1883 = vst.msk [vmem:[#allocation3 + $0xf0] sm:$0xff] %vm847_vm4, %v1835_v9  ;;  %v2392_v6 = vadd.f32 %v2306_v49, %v2183_v18  ;;  %v2046_v37 = vrot.slane %v1930_v34, 1  ;;  %v2255_v39 = vrot.slane %v1930_v34, 2  ;;  %v2101_v49 = vpop.permute.xlu2 %2100 }
 0x1b2   : > { %v2070_v45 = vsel %vm1997_vm6, %v2068_v4, %v2069_v42  ;;  %v2279_v57 = vsel %vm2206_vm5, %v2277_v8, %v2278_v3 }
 0x1b3   : > { %2425 = vst.msk [vmem:[%s3485_s14 + $0x48] sm:$0xff] %vm2415_vm7, %v2392_v6  ;;  %v2047_v16 = vsel %vm1997_vm6, %v2044_v63, %v2046_v37  ;;  %v1706_v40 = vpop.f32.mrf.mxu2  ;;  %v2256_v41 = vsel %vm2206_vm5, %v2253_v33, %v2255_v39  ;;  %v1803_v63 = vld [vmem:[#allocation3 + $0x170] sm:$0xff] }
 0x1b4   : > { %v1206_v48 = vpop.f32.mrf.mxu1  ;;  %2323 = vrot.lane.b32.xlu2 %v2254_v46, %s2811_s6  ;;  %2116 = vrot.lane.b32.xlu1 %v2047_v16, %s2812_s7  ;;  %v1748_v31 = vpop.f32.mrf.mxu3  ;;  %v2185_v46 = vadd.f32 %v2101_v49, %v3489_v62 }
 0x1b5   : > { %v1334_v53 = vadd.f32 %v1286_v29, %v1206_v48  ;;  %2325 = vrot.lane.b32.xlu0 %v2256_v41, %s2811_s6  ;;  %v1850_v15 = vadd.f32 %v1802_v51, %v1748_v31  ;;  %v805_v58 = vpop.f32.mrf.mxu0  ;;  %v1287_v5 = vld [vmem:[#allocation3 + $0x108] sm:$0xff]  ;;  %v1804_v29 = vld [vmem:[#allocation3 + $0x178] sm:$0xff] }
 0x1b6   : > { %v1788_v59 = vld [vmem:[#allocation3 + $0xf8] sm:$0xff]  ;;  %882 = vst.msk [vmem:[#allocation3 + $0x110] sm:$0xff] %vm847_vm4, %v805_v58 }
 0x1b7   : > { %1382 = vst.msk [vmem:[#allocation3 + $0x100] sm:$0xff] %vm847_vm4, %v1334_v53  ;;  %v1836_v32 = vadd.f32 %v1788_v59, %v1706_v40  ;;  %v3691_v0 = vld [vmem:[#allocation3 + $0x160] sm:$0xff] }
 0x1b8   : > { %1898 = vst.msk [vmem:[#allocation3 + $0x168] sm:$0xff] %vm847_vm4, %v1850_v15  ;;  %v2071_v44 = vrot.slane %v3691_v0, 1  ;;  %v3707_v17 = vld [vmem:[#allocation3 + $0xf0] sm:$0xff] }
 0x1b9   : > { %1884 = vst.msk [vmem:[#allocation3 + $0xf8] sm:$0xff] %vm847_vm4, %v1836_v32  ;;  %v2257_v27 = vrot.slane %v3707_v17, 2  ;;  %v2048_v18 = vrot.slane %v3707_v17, 1 }
 0x1ba   : > { %v2072_v7 = vsel %vm1997_vm6, %v2069_v42, %v2071_v44 }
 0x1bb   : > { %v1709_v10 = vpop.f32.mrf.mxu2 }
 0x1bc   : > { %v1209_v11 = vpop.f32.mrf.mxu1  ;;  %2134 = vrot.lane.b32.xlu1 %v2070_v45, %s2812_s7  ;;  %2136 = vrot.lane.b32.xlu2 %v2072_v7, %s2812_s7  ;;  %v1751_v14 = vpop.f32.mrf.mxu3 }
 0x1bd   : > { %v1335_v47 = vadd.f32 %v1287_v5, %v1209_v11  ;;  %2343 = vrot.lane.b32.xlu0 %v2279_v57, %s2811_s6  ;;  %v1851_v19 = vadd.f32 %v1803_v63, %v1751_v14  ;;  %v808_v28 = vpop.f32.mrf.mxu0  ;;  %v1288_v34 = vld [vmem:[#allocation3 + $0x110] sm:$0xff] }
 0x1be   : > { %v1789_v20 = vld [vmem:[#allocation3 + $0x100] sm:$0xff]  ;;  %v2099_v1 = vpop.permute.xlu1 %2098  ;;  %883 = vst.msk [vmem:[#allocation3 + $0x118] sm:$0xff] %vm847_vm4, %v808_v28  ;;  %v2308_v24 = vpop.permute.xlu0 %2307 }
 0x1bf   : > { %1383 = vst.msk [vmem:[#allocation3 + $0x108] sm:$0xff] %vm847_vm4, %v1335_v47  ;;  %v1837_v22 = vadd.f32 %v1789_v20, %v1709_v10  ;;  %v2184_v23 = vadd.f32 %v2099_v1, %v3474_v54  ;;  %v3738_v8 = vld [vmem:[#allocation3 + $0x168] sm:$0xff] }
 0x1c0   : > { %1899 = vst.msk [vmem:[#allocation3 + $0x170] sm:$0xff] %vm847_vm4, %v1851_v19  ;;  %v3713_v12 = vld [vmem:[#allocation3 + $0xf8] sm:$0xff]  ;;  %v2073_v14 = vrot.slane %v3738_v8, 1 }
 0x1c1   : > { %1885 = vst.msk [vmem:[#allocation3 + $0x100] sm:$0xff] %vm847_vm4, %v1837_v22  ;;  %v2393_v43 = vadd.f32 %v2308_v24, %v2184_v23  ;;  %v2258_v9 = vrot.slane %v3713_v12, 2  ;;  %v2049_v33 = vrot.slane %v3713_v12, 1  ;;  %v2312_v24 = vpop.permute.xlu2 %2311 }
 0x1c3   : > { %2426 = vst.msk [vmem:[%s3485_s14 + $0x50] sm:$0xff] %vm2415_vm7, %v2393_v43  ;;  %v2259_v54 = vsel %vm2206_vm5, %v2257_v27, %v2258_v9  ;;  %v1712_v6 = vpop.f32.mrf.mxu2  ;;  %v2050_v36 = vsel %vm1997_vm6, %v2048_v18, %v2049_v33 }
 0x1c4   : > { %v1212_v37 = vpop.f32.mrf.mxu1  ;;  %2327 = vrot.lane.b32.xlu1 %v2259_v54, %s2811_s6  ;;  %2118 = vrot.lane.b32.xlu2 %v2050_v36, %s2812_s7  ;;  %v1754_v39 = vpop.f32.mrf.mxu3 }
 0x1c5   : > { %v1336_v16 = vadd.f32 %v1288_v34, %v1212_v37  ;;  %v1852_v40 = vadd.f32 %v1804_v29, %v1754_v39  ;;  %v1289_v59 = vld [vmem:[#allocation3 + $0x118] sm:$0xff] }
 0x1c6   : > { %v1790_v48 = vld [vmem:[#allocation3 + $0x108] sm:$0xff]  ;;  %v2310_v41 = vpop.permute.xlu1 %2309 }
 0x1c7   : > { %1384 = vst.msk [vmem:[#allocation3 + $0x110] sm:$0xff] %vm847_vm4, %v1336_v16  ;;  %v1838_v31 = vadd.f32 %v1790_v48, %v1712_v6  ;;  %v2394_v51 = vadd.f32 %v2310_v41, %v2185_v46  ;;  %v3736_v4 = vld [vmem:[#allocation3 + $0x170] sm:$0xff] }
 0x1c8   : > { %1900 = vst.msk [vmem:[#allocation3 + $0x178] sm:$0xff] %vm847_vm4, %v1852_v40  ;;  %v1933_v53 = vld [vmem:[#allocation3 + $0x100] sm:$0xff]  ;;  %v2074_v10 = vrot.slane %v3736_v4, 1  ;;  %v2283_v16 = vrot.slane %v3736_v4, 2 }
 0x1c9   : > { %1886 = vst.msk [vmem:[#allocation3 + $0x108] sm:$0xff] %vm847_vm4, %v1838_v31  ;;  %v2051_v15 = vrot.slane %v1933_v53, 1  ;;  %v2260_v58 = vrot.slane %v1933_v53, 2  ;;  %v2282_v53 = vrot.slane %v3738_v8, 2 }
 0x1ca   : > { %2427 = vst.msk [vmem:[%s3485_s14 + $0x58] sm:$0xff] %vm2415_vm7, %v2394_v51  ;;  %v2075_v47 = vsel %vm1997_vm6, %v2073_v14, %v2074_v10  ;;  %v2280_v51 = vrot.slane %v3691_v0, 2 }
 0x1cb   : > { %v2052_v62 = vsel %vm1997_vm6, %v2049_v33, %v2051_v15  ;;  %v1715_v32 = vpop.f32.mrf.mxu2  ;;  %v2261_v42 = vsel %vm2206_vm5, %v2258_v9, %v2260_v58  ;;  %v2284_v58 = vsel %vm2206_vm5, %v2282_v53, %v2283_v16 }
 0x1cc   : > { %v1215_v44 = vpop.f32.mrf.mxu1  ;;  %2120 = vrot.lane.b32.xlu0 %v2052_v62, %s2812_s7  ;;  %2329 = vrot.lane.b32.xlu2 %v2261_v42, %s2811_s6 }
 0x1cd   : > { %v1337_v5 = vadd.f32 %v1289_v59, %v1215_v44  ;;  %v2281_v59 = vsel %vm2206_vm5, %v2278_v3, %v2280_v51 }
 0x1ce   : > { %v1791_v7 = vld [vmem:[#allocation3 + $0x110] sm:$0xff] }
 0x1cf   : > { %1385 = vst.msk [vmem:[#allocation3 + $0x118] sm:$0xff] %vm847_vm4, %v1337_v5  ;;  %v1839_v45 = vadd.f32 %v1791_v7, %v1715_v32  ;;  %v1948_v11 = vld [vmem:[#allocation3 + $0x178] sm:$0xff] }
 0x1d0   : > { %v2076_v57 = vrot.slane %v1948_v11, 1  ;;  %v3748_v28 = vld [vmem:[#allocation3 + $0x108] sm:$0xff]  ;;  %v2285_v36 = vrot.slane %v1948_v11, 2 }
 0x1d1   : > { %1887 = vst.msk [vmem:[#allocation3 + $0x110] sm:$0xff] %vm847_vm4, %v1839_v45  ;;  %v2262_v43 = vrot.slane %v3748_v28, 2  ;;  %v2053_v33 = vrot.slane %v3748_v28, 1 }
 0x1d2   : > { %v2077_v63 = vsel %vm1997_vm6, %v2074_v10, %v2076_v57  ;;  %v2286_v41 = vsel %vm2206_vm5, %v2283_v16, %v2285_v36 }
 0x1d3   : > { %2140 = vrot.lane.b32.xlu1 %v2077_v63, %s2812_s7  ;;  %v1718_v19 = vpop.f32.mrf.mxu2 }
 0x1d4   : > { %2138 = vrot.lane.b32.xlu0 %v2075_v47, %s2812_s7 }
 0x1d6   : > { %v1792_v20 = vld [vmem:[#allocation3 + $0x118] sm:$0xff]  ;;  %v2103_v1 = vpop.permute.xlu0 %2102  ;;  %v2107_v37 = vpop.permute.xlu2 %2106 }
 0x1d7   : > { %v1840_v22 = vadd.f32 %v1792_v20, %v1718_v19  ;;  %v2186_v23 = vadd.f32 %v2103_v1, %v3520_v50  ;;  %v2188_v62 = vadd.f32 %v2107_v37, %v3555_v2 }
 0x1d8   : > { %v3751_v27 = vld [vmem:[#allocation3 + $0x110] sm:$0xff] }
 0x1d9   : > { %1888 = vst.msk [vmem:[#allocation3 + $0x118] sm:$0xff] %vm847_vm4, %v1840_v22  ;;  %v2395_v9 = vadd.f32 %v2312_v24, %v2186_v23  ;;  %v2263_v18 = vrot.slane %v3751_v27, 2  ;;  %v2054_v49 = vrot.slane %v3751_v27, 1 }
 0x1db   : > { %2428 = vst.msk [vmem:[%s3485_s14 + $0x60] sm:$0xff] %vm2415_vm7, %v2395_v9  ;;  %v2264_v34 = vsel %vm2206_vm5, %v2262_v43, %v2263_v18  ;;  %v2055_v50 = vsel %vm1997_vm6, %v2053_v33, %v2054_v49 }
 0x1dc   : > { %2331 = vrot.lane.b32.xlu0 %v2264_v34, %s2811_s6  ;;  %2122 = vrot.lane.b32.xlu1 %v2055_v50, %s2812_s7 }
 0x1de   : > { %v2105_v54 = vpop.permute.xlu1 %2104  ;;  %v2314_v39 = vpop.permute.xlu0 %2313 }
 0x1df   : > { %v2187_v6 = vadd.f32 %v2105_v54, %v3525_v52  ;;  %v2318_v15 = vpop.permute.xlu2 %2317 }
 0x1e0   : > { %v1936_v29 = vld [vmem:[#allocation3 + $0x118] sm:$0xff] }
 0x1e1   : > { %v2396_v46 = vadd.f32 %v2314_v39, %v2187_v6  ;;  %v2056_v40 = vrot.slane %v1936_v29, 1  ;;  %v2265_v48 = vrot.slane %v1936_v29, 2 }
 0x1e3   : > { %2429 = vst.msk [vmem:[%s3485_s14 + $0x68] sm:$0xff] %vm2415_vm7, %v2396_v46  ;;  %v2057_v31 = vsel %vm1997_vm6, %v2054_v49, %v2056_v40  ;;  %v2266_v52 = vsel %vm2206_vm5, %v2263_v18, %v2265_v48 }
 0x1e4   : > { %2349 = vrot.lane.b32.xlu0 %v2286_v41, %s2811_s6  ;;  %2124 = vrot.lane.b32.xlu2 %v2057_v31, %s2812_s7 }
 0x1e5   : > { %2333 = vrot.lane.b32.xlu1 %v2266_v52, %s2811_s6 }
 0x1e7   : > { %v2336_v0 = vpop.permute.xlu2 %2335 }
 0x1ec   : > { %2347 = vrot.lane.b32.xlu2 %v2284_v58, %s2811_s6 }
 0x1ed   : > { %2345 = vrot.lane.b32.xlu1 %v2281_v59, %s2811_s6 }
 0x1ee   : > { %v2316_v32 = vpop.permute.xlu1 %2315 }
 0x1ef   : > { %v2397_v42 = vadd.f32 %v2316_v32, %v2188_v62 }
 0x1f1   : > { %2430 = vst.msk [vmem:[%s3485_s14 + $0x70] sm:$0xff] %vm2415_vm7, %v2397_v42 }
 0x1f6   : > { %v2109_v44 = vpop.permute.xlu0 %2108  ;;  %v2113_v45 = vpop.permute.xlu2 %2112 }
 0x1f7   : > { %v2189_v5 = vadd.f32 %v2109_v44, %v3560_v56  ;;  %v2191_v20 = vadd.f32 %v2113_v45, %v3608_v60 }
 0x1f9   : > { %v2398_v7 = vadd.f32 %v2318_v15, %v2189_v5 }
 0x1fb   : > { %2431 = vst.msk [vmem:[%s3485_s14 + $0x78] sm:$0xff] %vm2415_vm7, %v2398_v7 }
 0x1fd   : > { %v2129_v10 = vpop.permute.xlu1 %2128 }
 0x1fe   : > { %v2127_v3 = vpop.permute.xlu0 %2126  ;;  %v2199_v57 = vadd.f32 %v2129_v10, %v3584_v25  ;;  %v2131_v14 = vpop.permute.xlu2 %2130 }
 0x1ff   : > { %v2198_v11 = vadd.f32 %v2127_v3, %v3586_v30  ;;  %v2200_v25 = vadd.f32 %v2131_v14, %v3636_v13 }
 0x201   : > { %v2407_v2 = vadd.f32 %v2336_v0, %v2198_v11 }
 0x203   : > { %2440 = vst.msk [vmem:[%s3485_s14 + $0xc0] sm:$0xff] %vm2415_vm7, %v2407_v2 }
 0x206   : > { %v2338_v63 = vpop.permute.xlu0 %2337  ;;  %v2111_v19 = vpop.permute.xlu1 %2110 }
 0x207   : > { %v2408_v47 = vadd.f32 %v2338_v63, %v2199_v57  ;;  %v2190_v56 = vadd.f32 %v2111_v19, %v3603_v21  ;;  %v2342_v23 = vpop.permute.xlu2 %2341 }
 0x209   : > { %2441 = vst.msk [vmem:[%s3485_s14 + $0xc8] sm:$0xff] %vm2415_vm7, %v2408_v47 }
 0x20e   : > { %v2320_v30 = vpop.permute.xlu0 %2319 }
 0x20f   : > { %v2399_v1 = vadd.f32 %v2320_v30, %v2190_v56  ;;  %v2322_v22 = vpop.permute.xlu1 %2321  ;;  %v2324_v33 = vpop.permute.xlu2 %2323 }
 0x210   : > { %v2400_v24 = vadd.f32 %v2322_v22, %v2191_v20 }
 0x211   : > { %2432 = vst.msk [vmem:[%s3485_s14 + $0x80] sm:$0xff] %vm2415_vm7, %v2399_v1 }
 0x212   : > { %2433 = vst.msk [vmem:[%s3485_s14 + $0x88] sm:$0xff] %vm2415_vm7, %v2400_v24 }
 0x216   : > { %v2133_v43 = vpop.permute.xlu0 %2132 }
 0x217   : > { %v2201_v9 = vadd.f32 %v2133_v43, %v3633_v35  ;;  %v2340_v21 = vpop.permute.xlu1 %2339  ;;  %v2137_v54 = vpop.permute.xlu2 %2136 }
 0x218   : > { %v2409_v18 = vadd.f32 %v2340_v21, %v2200_v25  ;;  %v2203_v45 = vadd.f32 %v2137_v54, %v3683_v26 }
 0x219   : > { %v2410_v60 = vadd.f32 %v2342_v23, %v2201_v9 }
 0x21a   : > { %2442 = vst.msk [vmem:[%s3485_s14 + $0xd0] sm:$0xff] %vm2415_vm7, %v2409_v18 }
 0x21b   : > { %2443 = vst.msk [vmem:[%s3485_s14 + $0xd8] sm:$0xff] %vm2415_vm7, %v2410_v60 }
 0x21e   : > { %v2115_v49 = vpop.permute.xlu0 %2114 }
 0x21f   : > { %v2192_v34 = vadd.f32 %v2115_v49, %v3654_v55  ;;  %v2119_v37 = vpop.permute.xlu2 %2118 }
 0x220   : > { %v2194_v55 = vadd.f32 %v2119_v37, %v3707_v17 }
 0x221   : > { %v2401_v50 = vadd.f32 %v2324_v33, %v2192_v34 }
 0x223   : > { %2434 = vst.msk [vmem:[%s3485_s14 + $0x90] sm:$0xff] %vm2415_vm7, %v2401_v50 }
 0x226   : > { %v2117_v13 = vpop.permute.xlu1 %2116 }
 0x227   : > { %v2193_v35 = vadd.f32 %v2117_v13, %v3658_v38  ;;  %v2326_v6 = vpop.permute.xlu0 %2325  ;;  %v2330_v40 = vpop.permute.xlu2 %2329 }
 0x229   : > { %v2402_v36 = vadd.f32 %v2326_v6, %v2193_v35 }
 0x22b   : > { %2435 = vst.msk [vmem:[%s3485_s14 + $0x98] sm:$0xff] %vm2415_vm7, %v2402_v36 }
 0x22e   : > { %v2135_v39 = vpop.permute.xlu1 %2134 }
 0x22f   : > { %v2202_v29 = vadd.f32 %v2135_v39, %v3686_v61  ;;  %v2344_v46 = vpop.permute.xlu0 %2343 }
 0x231   : > { %v2411_v16 = vadd.f32 %v2344_v46, %v2202_v29 }
 0x233   : > { %2444 = vst.msk [vmem:[%s3485_s14 + $0xe0] sm:$0xff] %vm2415_vm7, %v2411_v16 }
 0x236   : > { %v2328_v48 = vpop.permute.xlu1 %2327 }
 0x237   : > { %v2403_v41 = vadd.f32 %v2328_v48, %v2194_v55 }
 0x239   : > { %2436 = vst.msk [vmem:[%s3485_s14 + $0xa0] sm:$0xff] %vm2415_vm7, %v2403_v41 }
 0x23e   : > { %v2121_v38 = vpop.permute.xlu0 %2120  ;;  %v2125_v31 = vpop.permute.xlu2 %2124 }
 0x23f   : > { %v2195_v52 = vadd.f32 %v2121_v38, %v3713_v12  ;;  %v2197_v0 = vadd.f32 %v2125_v31, %v3751_v27 }
 0x241   : > { %v2404_v51 = vadd.f32 %v2330_v40, %v2195_v52 }
 0x243   : > { %2437 = vst.msk [vmem:[%s3485_s14 + $0xa8] sm:$0xff] %vm2415_vm7, %v2404_v51 }
 0x245   : > { %v2141_v61 = vpop.permute.xlu1 %2140 }
 0x246   : > { %v2139_v53 = vpop.permute.xlu0 %2138  ;;  %v2348_v17 = vpop.permute.xlu2 %2347  ;;  %v2205_v12 = vadd.f32 %v2141_v61, %v3736_v4 }
 0x247   : > { %v2204_v15 = vadd.f32 %v2139_v53, %v3738_v8 }
 0x249   : > { %v2413_v58 = vadd.f32 %v2348_v17, %v2204_v15 }
 0x24b   : > { %2446 = vst.msk [vmem:[%s3485_s14 + $0xf0] sm:$0xff] %vm2415_vm7, %v2413_v58 }
 0x24e   : > { %v2332_v59 = vpop.permute.xlu0 %2331  ;;  %v2123_v62 = vpop.permute.xlu1 %2122 }
 0x24f   : > { %v2196_v32 = vadd.f32 %v2123_v62, %v3748_v28 }
 0x251   : > { %v2405_v42 = vadd.f32 %v2332_v59, %v2196_v32 }
 0x253   : > { %2438 = vst.msk [vmem:[%s3485_s14 + $0xb0] sm:$0xff] %vm2415_vm7, %v2405_v42 }
 0x256   : > { %v2350_v44 = vpop.permute.xlu0 %2349 }
 0x257   : > { %v2414_v5 = vadd.f32 %v2350_v44, %v2205_v12  ;;  %v2334_v8 = vpop.permute.xlu1 %2333 }
 0x258   : > { %v2406_v7 = vadd.f32 %v2334_v8, %v2197_v0 }
 0x259   : > { %2447 = vst.msk [vmem:[%s3485_s14 + $0xf8] sm:$0xff] %vm2415_vm7, %v2414_v5 }
 0x25a   : > { %2439 = vst.msk [vmem:[%s3485_s14 + $0xb8] sm:$0xff] %vm2415_vm7, %v2406_v7 }
 0x25f   : > { %v2346_v10 = vpop.permute.xlu1 %2345 }
 0x260   : > { %v2412_v3 = vadd.f32 %v2346_v10, %v2203_v45 }
 0x262   : > { %2445 = vst.msk [vmem:[%s3485_s14 + $0xe8] sm:$0xff] %vm2415_vm7, %v2412_v3 }
 0x263 PF: > { %s14_s17 = sadd.s32 1, %s2808_s17   ;;  %s3850_s15 = smov %s2804_s16 }
 0x264   : > { %p11_p5 = scmp.ge.s32.totalorder %s14_s17, 4   ;;  %s3851_s16 = smov %s3853_s18 }
 0x266   :  { %13 = sbr.rel (!%p11_p5) target bundleno = 2 (0x2), region = 77 }

</bundles_post_ra>
